<compile_context>
chip_gen: v5e
topology: v5e:2x2
jax: 0.10.0
libtpu: 0.0.40
codegen_flags: <defaults>
</compile_context>

<pallas_src>
import jax
import jax.numpy as jnp
from jax.experimental import pallas as pl
from jax.experimental.pallas import tpu as pltpu


def _detect_packed_mxu():
  """True on chips with a 256x256 MXU (v6e / v7x); False on 128-wide MXUs."""
  try:
    kind = jax.devices()[0].device_kind.lower()
  except Exception:
    return True
  for tag in ("v2", "v3", "v4", "v5"):
    if tag in kind:
      return False
  return True


_USE_PACKED = _detect_packed_mxu()


# ----------------------------- Pallas kernels -----------------------------

def _fused_kernel_packed(pred_ref, gt_ref, w1_ref, b1_ref, w2_ref, b2_ref,
                         o_ref):
  """Both backbones packed into 256-wide matmuls (v6e/v7x MXU is 2x256x256).

  pred/gt tiles are concatenated along M so each (frozen, norm-folded) weight
  matrix is staged into the MXU once per tile.  MXU operands are bf16;
  bias / ReLU / diff / square / sum stay in f32.
  """
  t = pred_ref.shape[0]
  x = jnp.concatenate([pred_ref[...], gt_ref[...]], axis=0)      # (2T, K) bf16
  h1 = jnp.dot(x, w1_ref[...], preferred_element_type=jnp.float32) + b1_ref[...]
  h1 = jnp.maximum(h1, 0.0)                                      # f32
  f = jnp.dot(h1.astype(jnp.bfloat16), w2_ref[...],
              preferred_element_type=jnp.float32) + b2_ref[...]
  f = jnp.maximum(f, 0.0)                                        # (2T, 2*C2) f32
  d = f[:t, :] - f[t:, :]                                        # f32 diff
  s = jnp.sum(d * d, axis=0, keepdims=True)                      # (1, 2*C2)
  # Fill the whole (8, 2*C2) block (identical sublane rows) -> unmasked,
  # lane-dense stores; JAX side reads row 0 of each block.
  o_ref[...] = jnp.broadcast_to(s, o_ref.shape)


def _fused_kernel_unpacked(pred_ref, gt_ref,
                           w1a_ref, b1a_ref, w2a_ref, b2a_ref,
                           w1b_ref, b1b_ref, w2b_ref, b2b_ref, o_ref):
  """Per-backbone 128-wide dots (v5e MXU is 4x128x128: keep 128-wide dots)."""
  t = pred_ref.shape[0]
  x = jnp.concatenate([pred_ref[...], gt_ref[...]], axis=0)      # (2T, K) bf16

  def sq_sum(w1, b1, w2, b2):
    h1 = jnp.maximum(
        jnp.dot(x, w1, preferred_element_type=jnp.float32) + b1, 0.0)
    f = jnp.maximum(
        jnp.dot(h1.astype(jnp.bfloat16), w2,
                preferred_element_type=jnp.float32) + b2, 0.0)
    d = f[:t, :] - f[t:, :]
    return jnp.sum(d * d, axis=0, keepdims=True)                 # (1, C2)

  s1 = sq_sum(w1a_ref[...], b1a_ref[...], w2a_ref[...], b2a_ref[...])
  s2 = sq_sum(w1b_ref[...], b1b_ref[...], w2b_ref[...], b2b_ref[...])
  s = jnp.concatenate([s1, s2], axis=-1)                         # (1, 2*C2)
  o_ref[...] = jnp.broadcast_to(s, o_ref.shape)


# ----------------------------- Pallas wrapper -----------------------------

def _pick_tile_m(m):
  for t in (1024, 512, 256, 128, 64, 32, 16, 8):
    if t <= m:
      return t
  return 8


def fused_content_sums(pred_patches, gt_patches, pa, pb):
  """Returns (sum_sqdiff_backbone_a, sum_sqdiff_backbone_b) over valid rows."""
  m, k = pred_patches.shape
  c2 = pa["w2"].shape[1]
  bf16 = jnp.bfloat16

  tile_m = _pick_tile_m(m)
  num_tiles = pl.cdiv(m, tile_m)
  m_pad = num_tiles * tile_m
  if m_pad != m:
    # Zero-padded rows are identical for pred/gt -> identical features ->
    # zero contribution to the squared-difference sum.
    pad = ((0, m_pad - m), (0, 0))
    pred_patches = jnp.pad(pred_patches, pad)
    gt_patches = jnp.pad(gt_patches, pad)

  patch_spec = pl.BlockSpec((tile_m, k), lambda i: (i, 0))

  def resident(arr):
    return pl.BlockSpec(arr.shape, lambda i: (0, 0))

  out_spec = pl.BlockSpec((8, 2 * c2), lambda i: (i, 0))
  out_shape = jax.ShapeDtypeStruct((num_tiles * 8, 2 * c2), jnp.float32)

  if _USE_PACKED:
    # Pack both backbones: one (K, 256) conv1 and one (256, 256) block-diag
    # conv2 (the zero blocks are free: the MXU array is fully occupied anyway).
    w1_cat = jnp.concatenate([pa["w1"], pb["w1"]], axis=1).astype(bf16)
    b1_cat = jnp.concatenate([pa["b1"], pb["b1"]], axis=1)
    za = jnp.zeros_like(pa["w2"])
    zb = jnp.zeros_like(pb["w2"])
    w2_bd = jnp.concatenate(
        [jnp.concatenate([pa["w2"], za], axis=1),
         jnp.concatenate([zb, pb["w2"]], axis=1)], axis=0).astype(bf16)
    b2_cat = jnp.concatenate([pa["b2"], pb["b2"]], axis=1)
    args = (pred_patches, gt_patches, w1_cat, b1_cat, w2_bd, b2_cat)
    kernel = _fused_kernel_packed
  else:
    args = (pred_patches, gt_patches,
            pa["w1"].astype(bf16), pa["b1"], pa["w2"].astype(bf16), pa["b2"],
            pb["w1"].astype(bf16), pb["b1"], pb["w2"].astype(bf16), pb["b2"])
    kernel = _fused_kernel_unpacked

  in_specs = [patch_spec, patch_spec] + [resident(a) for a in args[2:]]

  out = pl.pallas_call(
      kernel,
      grid=(num_tiles,),
      in_specs=in_specs,
      out_specs=out_spec,
      out_shape=out_shape,
      compiler_params=pltpu.CompilerParams(
          dimension_semantics=("parallel",),
          vmem_limit_bytes=32 * 1024 * 1024),
  )(*args)

  rows = out.reshape(num_tiles, 8, 2 * c2)[:, 0, :]   # (num_tiles, 2*c2)
  s1 = jnp.sum(rows[:, :c2])
  s2 = jnp.sum(rows[:, c2:])
  return s1, s2


# ----------------------------- glue (plain JAX) -----------------------------

def _im2col_3x3_s2_p1(x_nhwc):
  """3x3 / stride-2 / pad-1 patches: (N,H,W,C) -> (N*OH*OW, 9*C) in bf16."""
  n, h, w, c = x_nhwc.shape
  oh, ow = h // 2, w // 2
  xp = jnp.pad(x_nhwc, ((0, 0), (1, 1), (1, 1), (0, 0)))
  cols = []
  for dy in range(3):
    for dx in range(3):
      cols.append(xp[:, dy:dy + h:2, dx:dx + w:2, :])      # (N, OH, OW, C)
  patches = jnp.concatenate(cols, axis=-1)                 # (N, OH, OW, 9*C)
  # bf16 patches halve input HBM traffic; the MXU operands are bf16 anyway.
  return patches.reshape(n * oh * ow, 9 * c).astype(jnp.bfloat16)


def fold_normalization(params, mean_c, std_c, c_in):
  """Fold per-channel (x-mean)/std into the frozen first conv (w1, b1).

  im2col column j corresponds to input channel (j % c_in), so
    P_norm @ w1 + b1 == P @ (w1 / std_vec[:,None]) + (b1 - (mean/std) @ w1).
  """
  k = params["w1"].shape[0]
  taps = k // c_in
  mean_vec = jnp.tile(mean_c, taps)                        # (k,)
  std_vec = jnp.tile(std_c, taps)                          # (k,)
  w1f = params["w1"] / std_vec[:, None]
  b1f = params["b1"] - (mean_vec / std_vec)[None, :] @ params["w1"]
  return {"w1": w1f, "b1": b1f, "w2": params["w2"], "b2": params["b2"]}


@jax.jit
def content_loss(pred, gt, mean_c, std_c, params_mb, params_rn):
  n, c, h, w = pred.shape
  # Normalization folded into the (frozen) first-layer weights of each backbone.
  pa = fold_normalization(params_mb, mean_c, std_c, c)
  pb = fold_normalization(params_rn, mean_c, std_c, c)

  pred_patches = _im2col_3x3_s2_p1(jnp.transpose(pred, (0, 2, 3, 1)))
  gt_patches = _im2col_3x3_s2_p1(jnp.transpose(gt, (0, 2, 3, 1)))
  m_valid = pred_patches.shape[0]                          # N*OH*OW (static)
  c2 = params_mb["w2"].shape[1]

  s_mb, s_rn = fused_content_sums(pred_patches, gt_patches, pa, pb)
  denom = float(m_valid * c2)                              # global element count
  loss1 = s_mb / denom
  loss2 = s_rn / denom
  return loss1 + loss2


def make_backbone_params(key, c_in, c1, c2):
  k1, k2, k3, k4 = jax.random.split(key, 4)
  return {
      "w1": 0.1 * jax.random.normal(k1, (9 * c_in, c1), jnp.float32),
      "b1": 0.01 * jax.random.normal(k2, (1, c1), jnp.float32),
      "w2": 0.1 * jax.random.normal(k3, (c1, c2), jnp.float32),
      "b2": 0.01 * jax.random.normal(k4, (1, c2), jnp.float32),
  }


if __name__ == "__main__":
  key = jax.random.PRNGKey(0)
  k_pred, k_gt, k_mb, k_rn = jax.random.split(key, 4)

  N, C, H, W = 2, 3, 16, 16          # NCHW, 3 channels (ImageNet normalization)
  pred = jax.random.uniform(k_pred, (N, C, H, W), jnp.float32)
  gt = jax.random.uniform(k_gt, (N, C, H, W), jnp.float32)

  mean_c = jnp.array([0.485, 0.456, 0.406], dtype=jnp.float32)
  std_c = jnp.array([0.229, 0.224, 0.225], dtype=jnp.float32)

  # Stand-in backbones with lane/MXU-friendly channel counts (128).
  params_mb = make_backbone_params(k_mb, C, c1=128, c2=128)   # mobilenet stand-in
  params_rn = make_backbone_params(k_rn, C, c1=128, c2=128)   # resnet stand-in

  loss = content_loss(pred, gt, mean_c, std_c, params_mb, params_rn)
  loss = jax.block_until_ready(loss)
  assert loss.shape == () and jnp.isfinite(loss)
  print("KERNEL_OK")
</pallas_src>

<mosaic_0001>
module attributes {stable_mosaic.version = 11 : i64} {
  func.func @_fused_kernel_packed(%arg0: i32, %arg1: memref<128x27xbf16, #tpu.memory_space<vmem>>, %arg2: memref<128x27xbf16, #tpu.memory_space<vmem>>, %arg3: memref<27x256xbf16, #tpu.memory_space<vmem>>, %arg4: memref<1x256xf32, #tpu.memory_space<vmem>>, %arg5: memref<256x256xbf16, #tpu.memory_space<vmem>>, %arg6: memref<1x256xf32, #tpu.memory_space<vmem>>, %arg7: memref<8x256xf32, #tpu.memory_space<vmem>>) attributes {dimension_semantics = [#tpu.dimension_semantics<parallel>], iteration_bounds = array<i64: 1>, scalar_prefetch = 0 : i64, scratch_operands = 0 : i64, tpu.core_type = #tpu.core_type<tc>, window_params = [{transform_indices = @transform_0, window_bounds = array<i64: 128, 27>}, {transform_indices = @transform_1, window_bounds = array<i64: 128, 27>}, {pipeline_mode = #tpu.pipeline_mode<synchronous>, transform_indices = @transform_2, window_bounds = array<i64: 27, 256>}, {pipeline_mode = #tpu.pipeline_mode<synchronous>, transform_indices = @transform_3, window_bounds = array<i64: 1, 256>}, {pipeline_mode = #tpu.pipeline_mode<synchronous>, transform_indices = @transform_4, window_bounds = array<i64: 256, 256>}, {pipeline_mode = #tpu.pipeline_mode<synchronous>, transform_indices = @transform_5, window_bounds = array<i64: 1, 256>}, {transform_indices = @transform_6, window_bounds = array<i64: 8, 256>}]} {
    %c0 = arith.constant 0 : index
    %c0_0 = arith.constant 0 : index
    %0 = vector.load %arg1[%c0, %c0_0] : memref<128x27xbf16, #tpu.memory_space<vmem>>, vector<128x27xbf16>
    %c0_1 = arith.constant 0 : index
    %c0_2 = arith.constant 0 : index
    %1 = vector.load %arg2[%c0_1, %c0_2] : memref<128x27xbf16, #tpu.memory_space<vmem>>, vector<128x27xbf16>
    %2 = tpu.concatenate %0, %1 in 0 : vector<128x27xbf16>, vector<128x27xbf16> -> vector<256x27xbf16>
    %c0_3 = arith.constant 0 : index
    %c0_4 = arith.constant 0 : index
    %3 = vector.load %arg3[%c0_3, %c0_4] : memref<27x256xbf16, #tpu.memory_space<vmem>>, vector<27x256xbf16>
    %cst = arith.constant dense<0.000000e+00> : vector<256x256xf32>
    %4 = tpu.matmul %2, %3, %cst {dimension_numbers = #tpu.dot_dimension_numbers<[1], [0], [0], [1], [0, 0, 1, 1], [], []>} : vector<256x27xbf16>, vector<27x256xbf16>, vector<256x256xf32> -> vector<256x256xf32>
    %c0_5 = arith.constant 0 : index
    %c0_6 = arith.constant 0 : index
    %5 = vector.load %arg4[%c0_5, %c0_6] : memref<1x256xf32, #tpu.memory_space<vmem>>, vector<1x256xf32>
    %6 = vector.broadcast %5 : vector<1x256xf32> to vector<256x256xf32>
    %7 = arith.addf %4, %6 : vector<256x256xf32>
    %cst_7 = arith.constant 0.000000e+00 : f32
    %8 = vector.broadcast %cst_7 : f32 to vector<256x256xf32>
    %9 = arith.maximumf %7, %8 : vector<256x256xf32>
    %10 = arith.truncf %9 : vector<256x256xf32> to vector<256x256xbf16>
    %c0_8 = arith.constant 0 : index
    %c0_9 = arith.constant 0 : index
    %11 = vector.load %arg5[%c0_8, %c0_9] : memref<256x256xbf16, #tpu.memory_space<vmem>>, vector<256x256xbf16>
    %cst_10 = arith.constant dense<0.000000e+00> : vector<256x256xf32>
    %12 = tpu.matmul %10, %11, %cst_10 {dimension_numbers = #tpu.dot_dimension_numbers<[1], [0], [0], [1], [0, 0, 1, 1], [], []>} : vector<256x256xbf16>, vector<256x256xbf16>, vector<256x256xf32> -> vector<256x256xf32>
    %c0_11 = arith.constant 0 : index
    %c0_12 = arith.constant 0 : index
    %13 = vector.load %arg6[%c0_11, %c0_12] : memref<1x256xf32, #tpu.memory_space<vmem>>, vector<1x256xf32>
    %14 = vector.broadcast %13 : vector<1x256xf32> to vector<256x256xf32>
    %15 = arith.addf %12, %14 : vector<256x256xf32>
    %cst_13 = arith.constant 0.000000e+00 : f32
    %16 = vector.broadcast %cst_13 : f32 to vector<256x256xf32>
    %17 = arith.maximumf %15, %16 : vector<256x256xf32>
    %18 = vector.extract_strided_slice %17 {offsets = [0, 0], sizes = [128, 256], strides = [1, 1]} : vector<256x256xf32> to vector<128x256xf32>
    %19 = vector.extract_strided_slice %17 {offsets = [128, 0], sizes = [128, 256], strides = [1, 1]} : vector<256x256xf32> to vector<128x256xf32>
    %20 = arith.subf %18, %19 : vector<128x256xf32>
    %21 = arith.mulf %20, %20 : vector<128x256xf32>
    %cst_14 = arith.constant dense<0.000000e+00> : vector<256xf32>
    %22 = vector.multi_reduction <add>, %21, %cst_14 [0] : vector<128x256xf32> to vector<256xf32>
    %23 = vector.shape_cast %22 : vector<256xf32> to vector<1x256xf32>
    %24 = vector.shape_cast %23 : vector<1x256xf32> to vector<1x256xf32>
    %25 = vector.broadcast %24 : vector<1x256xf32> to vector<8x256xf32>
    %c0_15 = arith.constant 0 : index
    %c0_16 = arith.constant 0 : index
    %26 = vector.load %arg7[%c0_15, %c0_16] : memref<8x256xf32, #tpu.memory_space<vmem>>, vector<8x256xf32>
    tpu.vector_store %arg7[%c0_15, %c0_16], %25 {strides = array<i32>} : memref<8x256xf32, #tpu.memory_space<vmem>>, vector<8x256xf32>,
    return
  }
  func.func @transform_0(%arg0: i32) -> (i32, i32) {
    %c0_i32 = arith.constant 0 : i32
    %c0_i32_0 = arith.constant 0 : i32
    return %arg0, %c0_i32 : i32, i32
  }
  func.func @transform_1(%arg0: i32) -> (i32, i32) {
    %c0_i32 = arith.constant 0 : i32
    %c0_i32_0 = arith.constant 0 : i32
    return %arg0, %c0_i32 : i32, i32
  }
  func.func @transform_2(%arg0: i32) -> (i32, i32) {
    %c0_i32 = arith.constant 0 : i32
    %c0_i32_0 = arith.constant 0 : i32
    %c0_i32_1 = arith.constant 0 : i32
    return %c0_i32, %c0_i32_0 : i32, i32
  }
  func.func @transform_3(%arg0: i32) -> (i32, i32) {
    %c0_i32 = arith.constant 0 : i32
    %c0_i32_0 = arith.constant 0 : i32
    %c0_i32_1 = arith.constant 0 : i32
    return %c0_i32, %c0_i32_0 : i32, i32
  }
  func.func @transform_4(%arg0: i32) -> (i32, i32) {
    %c0_i32 = arith.constant 0 : i32
    %c0_i32_0 = arith.constant 0 : i32
    %c0_i32_1 = arith.constant 0 : i32
    return %c0_i32, %c0_i32_0 : i32, i32
  }
  func.func @transform_5(%arg0: i32) -> (i32, i32) {
    %c0_i32 = arith.constant 0 : i32
    %c0_i32_0 = arith.constant 0 : i32
    %c0_i32_1 = arith.constant 0 : i32
    return %c0_i32, %c0_i32_0 : i32, i32
  }
  func.func @transform_6(%arg0: i32) -> (i32, i32) {
    %c0_i32 = arith.constant 0 : i32
    %c0_i32_0 = arith.constant 0 : i32
    return %arg0, %c0_i32 : i32, i32
  }
}

</mosaic_0001>

<bundles_post_ra>
// kernel: tile.30
= control target key start
LH: loop header
LB: loop body
LE: loop exit
PB: predicated region body
PF: predicated region fallthrough
CT: control target
= control target key end

     0   :  { %s28_s0 = inlined_call_operand.vmem [shape: f32[3], index: 0, kind: input, shape index: {}]   ;;  %s29_s1 = inlined_call_operand.vmem [shape: f32[9,3], index: 1, kind: output, shape index: {}]  }
   0x1   :  { %v4_v0 = vld [vmem:[%s28_s0] ss:$0 sm:$0xff] }
   0x2   :  { %5 = vst [vmem:[%s29_s1] sm:$0xff] %v4_v0 }
   0x3   :  { %8 = vst [vmem:[%s29_s1 + $0x8] sm:$0xff] %v4_v0 }

// kernel: div.13
= control target key start
LH: loop header
LB: loop body
LE: loop exit
PB: predicated region body
PF: predicated region fallthrough
CT: control target
= control target key end

     0   :  { %s75_s10 = smov 24   ;;  %s76_s11 = smov 18   ;;  %vm3_vm0 = vcmask 23552   ;;  %vm9_vm1 = vcmask 220352   ;;  %vm15_vm2 = vcmask 195752   ;;  %vm21_vm3 = vcmask 171152   ;;  %s123_s0 = inlined_call_operand.vmem [shape: f32[9,3], index: 0, kind: input, shape index: {}]   ;;  %s124_s1 = inlined_call_operand.vmem [shape: f32[27], index: 1, kind: output, shape index: {}]  }
   0x1   :  { %v59_v0 = vld [vmem:[%s123_s0 + $0x8] sm:$0x1]   ;;  %v61_v1 = vld [vmem:[%s123_s0 + $0x6] sm:$0x1]   ;;  %v63_v2 = vld [vmem:[%s123_s0 + $0x4] sm:$0x1]  }
   0x2   :  { %7 = vrot.lane.b32.xlu0 %v59_v0, %s75_s10  ;;  %19 = vrot.lane.b32.xlu1 %v61_v1, %s76_s11  ;;  %s77_s14 = smov 12   ;;  %v60_v3 = vld [vmem:[%s123_s0 + $0x7] sm:$0x1]   ;;  %v62_v4 = vld [vmem:[%s123_s0 + $0x5] sm:$0x1]   ;;  %s78_s19 = smov 21  }
   0x3   :  { %31 = vrot.lane.b32.xlu2 %v63_v2, %s77_s14  ;;  %s79_s20 = smov 15   ;;  %v64_v5 = vld [vmem:[%s123_s0 + $0x3] sm:$0x1]   ;;  %s80_s23 = smov 9   ;;  %v65_v6 = vld [vmem:[%s123_s0 + $0x2] sm:$0x1]  }
   0x4   :  { %v66_v7 = vld [vmem:[%s123_s0 + $0x1] sm:$0x1]   ;;  %s81_s28 = smov 6   ;;  %s82_s29 = smov 3   ;;  %v2_v8 = vld [vmem:[%s123_s0] sm:$0x1]  }
   0x5   :  { %4 = vst.msk [vmem:[#allocation0] sm:$0x1] %vm3_vm0, %v2_v8   ;;  %vm27_vm4 = vcmask 146552   ;;  %vm33_vm5 = vcmask 121952   ;;  %vm39_vm6 = vcmask 97352   ;;  %vm45_vm7 = vcmask 72752  }
   0x6   :  { %vm51_vm8 = vcmask 48152  }
   0xa   :  { %13 = vrot.lane.b32.xlu0 %v60_v3, %s78_s19  ;;  %25 = vrot.lane.b32.xlu1 %v62_v4, %s79_s20 }
   0xb   :  { %37 = vrot.lane.b32.xlu2 %v64_v5, %s80_s23 }
  0x12   :  { %43 = vrot.lane.b32.xlu0 %v65_v6, %s81_s28  ;;  %49 = vrot.lane.b32.xlu1 %v66_v7, %s82_s29 }
  0x5d   :  { %v32_v9 = vpop.permute.xlu2 %31  }
  0x65   :  { %v38_v10 = vpop.permute.xlu2 %37  }
  0x74   :  { %v8_v11 = vpop.permute.xlu0 %7   ;;  %v20_v12 = vpop.permute.xlu1 %19  }
  0x75   :  { %10 = vst.msk [vmem:[#allocation0] sm:$0x1] %vm9_vm1, %v8_v11  }
  0x7c   :  { %v14_v13 = vpop.permute.xlu0 %13   ;;  %v26_v14 = vpop.permute.xlu1 %25  }
  0x7d   :  { %16 = vst.msk [vmem:[#allocation0] sm:$0x1] %vm15_vm2, %v14_v13  }
  0x7e   :  { %22 = vst.msk [vmem:[#allocation0] sm:$0x1] %vm21_vm3, %v20_v12  }
  0x7f   :  { %28 = vst.msk [vmem:[#allocation0] sm:$0x1] %vm27_vm4, %v26_v14  }
  0x80   :  { %34 = vst.msk [vmem:[#allocation0] sm:$0x1] %vm33_vm5, %v32_v9  }
  0x81   :  { %40 = vst.msk [vmem:[#allocation0] sm:$0x1] %vm39_vm6, %v38_v10  }
  0x84   :  { %v44_v15 = vpop.permute.xlu0 %43   ;;  %v50_v16 = vpop.permute.xlu1 %49  }
  0x85   :  { %46 = vst.msk [vmem:[#allocation0] sm:$0x1] %vm45_vm7, %v44_v15  }
  0x86   :  { %52 = vst.msk [vmem:[#allocation0] sm:$0x1] %vm51_vm8, %v50_v16  }
  0x8d   :  { %v55_v17 = vld [vmem:[#allocation0] sm:$0x1] }
  0x8e   :  { %58 = vst [vmem:[%s124_s1] sm:$0x1] %v55_v17 }

// kernel: div.1
= control target key start
LH: loop header
LB: loop body
LE: loop exit
PB: predicated region body
PF: predicated region fallthrough
CT: control target
= control target key end

     0   :  { %s50_s0 = inlined_call_operand.vmem [shape: f32[27], index: 0, kind: input, shape index: {}]   ;;  %s51_s1 = inlined_call_operand.vmem [shape: f32[27], index: 1, kind: input, shape index: {}]   ;;  %s52_s2 = inlined_call_operand.vmem [shape: f32[27], index: 2, kind: output, shape index: {}]  }
   0x1   :  { %v4_v0 = vld [vmem:[%s51_s1] sm:$0x1] }
   0x2   :  { %24 = vrcp.f32 %v4_v0  ;;  %v18_v3 = vand.u32 2147483648, %v4_v0  ;;  %vm12_vm0 = vweird.f32 %v4_v0  ;;  %v16_v5 = vand.u32 2147483647, %v4_v0  ;;  %v3_v9 = vld [vmem:[%s50_s0] sm:$0x1] }
   0x4   :  { %v19_v7 = vor.u32 1.1754944e-38, %v18_v3  ;;  %vm17_vm3 = vcmp.eq.f32.partialorder %v16_v5, 8.507059e+37 }
   0x8   :  { %v25_v1 = vpop.eup %24 }
   0x9   :  { %v8_v2 = vmul.f32 %v25_v1, %v4_v0  ;;  %vm13_vm1 = vweird.f32 %v25_v1 }
   0xa   :  { %vm14_vm2 = vmor %vm12_vm0, %vm13_vm1 }
   0xb   :  { %v9_v4 = vsub.f32 1.0, %v8_v2 }
   0xd   :  { %v10_v6 = vmul.f32 %v25_v1, %v9_v4 }
   0xf   :  { %v11_v8 = vadd.f32 %v25_v1, %v10_v6 }
  0x11   :  { %v15_v10 = vsel %vm14_vm2, %v25_v1, %v11_v8 }
  0x12   :  { %v20_v11 = vsel %vm17_vm3, %v19_v7, %v15_v10 }
  0x13   :  { %v21_v12 = vmul.f32 %v20_v11, %v3_v9 }
  0x15   :  { %23 = vst [vmem:[%s52_s2] sm:$0x1] %v21_v12 }

// kernel: content_loss.1
= control target key start
LH: loop header
LB: loop body
LE: loop exit
PB: predicated region body
PF: predicated region fallthrough
CT: control target
= control target key end

     0   :  { %vm213_vm0 = vcmask 1044480   ;;  %vm214_vm1 = vcmask 1045504   ;;  %v1532_v2 = vmov 65535   ;;  %vm164_vm2 = vcmask 220160   ;;  %s2206_s2 = inlined_call_operand.vmem [shape: bf16[27,256], index: 2, kind: input, shape index: {}]   ;;  %s2207_s4 = inlined_call_operand.vmem [shape: bf16[256,256], index: 4, kind: input, shape index: {}]   ;;  %s2208_s0 = inlined_call_operand.vmem [shape: bf16[128,27], index: 0, kind: input, shape index: {}]   ;;  %s2209_s1 = inlined_call_operand.vmem [shape: bf16[128,27], index: 1, kind: input, shape index: {}]   ;;  %s2210_s3 = inlined_call_operand.vmem [shape: f32[1,256], index: 3, kind: input, shape index: {}]   ;;  %s2211_s5 = inlined_call_operand.vmem [shape: f32[1,256], index: 5, kind: input, shape index: {}]   ;;  %s2212_s6 = inlined_call_operand.vmem [shape: f32[8,256], index: 6, kind: output, shape index: {}]  }
   0x1   :  { %v1301_v0 = vld [vmem:[%s2206_s2 + $0x10] sm:$0xf]  ;;  %v1486_v1 = vld [vmem:[%s2206_s2 + $0x14] sm:$0x30]  ;;  %v215_v3 = vsel %vm213_vm0, 4294967295, %v1532_v2  ;;  %v1467_v25 = vld [vmem:[%s2208_s0] sm:$0xff] }
   0x2   :  { %v1302_v4 = vor.u32 %v1486_v1, %v1301_v0  ;;  %v216_v5 = vsel %vm214_vm1, %v215_v3, 0  ;;  %v1485_v6 = vld [vmem:[%s2206_s2 + $0x14] sm:$0xf]  ;;  %v1303_v7 = vld [vmem:[%s2206_s2 + $0x18] sm:$0x30]  ;;  %v1476_v26 = vld [vmem:[%s2209_s1 + $0x8] sm:$0xff] }
   0x3   :  { %v1306_v8 = vor.u32 %v1485_v6, %v1303_v7  ;;  %v1293_v9 = vld [vmem:[%s2206_s2] sm:$0xf]  ;;  %v1484_v10 = vld [vmem:[%s2206_s2 + $0x4] sm:$0xf0]  ;;  %v1483_v12 = vld [vmem:[%s2206_s2 + $0x4] sm:$0xf] }
   0x4   :  { %v218_v11 = vand.u32 %v1302_v4, %v216_v5  ;;  %v1295_v13 = vld [vmem:[%s2206_s2 + $0x8] sm:$0xf0]  ;;  %v1397_v15 = vld [vmem:[%s2207_s4 + $0x70] sm:$0xf]  ;;  %v1502_v16 = vld [vmem:[%s2207_s4 + $0x74] sm:$0xf0]  ;;  %v1294_v18 = vor.u32 %v1484_v10, %v1293_v9 }
   0x5   :  { %v221_v14 = vand.u32 %v1306_v8, %v216_v5  ;;  %v1461_v17 = vld [vmem:[%s2207_s4 + $0xf0] sm:$0xf]  ;;  %v1518_v19 = vld [vmem:[%s2207_s4 + $0xf4] sm:$0xf0]  ;;  %v1298_v20 = vor.u32 %v1483_v12, %v1295_v13  ;;  %v1398_v21 = vor.u32 %v1502_v16, %v1397_v15  ;;  %v1501_v23 = vld [vmem:[%s2207_s4 + $0x74] sm:$0xf] }
   0x6   :  { %229 = vmatpush.bf16.msra.mxu0 %v218_v11  ;;  %1519 = vmatpush.bf16.msra.mxu2 %v218_v11  ;;  %v1462_v22 = vor.u32 %v1518_v19, %v1461_v17  ;;  %v1399_v24 = vld [vmem:[%s2207_s4 + $0x78] sm:$0xf0]  ;;  %v1619_v27 = vld [vmem:[%s2209_s1] sm:$0xff]  ;;  %v1517_v29 = vld [vmem:[%s2207_s4 + $0xf4] sm:$0xf] }
   0x7   :  { %318 = vmatpush.bf16.msra.mxu1 %v221_v14  ;;  %1521 = vmatpush.bf16.msra.mxu3 %v221_v14  ;;  %v1621_v28 = vor.u32 %v1501_v23, %v1399_v24  ;;  %v1463_v30 = vld [vmem:[%s2207_s4 + $0xf8] sm:$0xf0]  ;;  %v1389_v32 = vld [vmem:[%s2207_s4 + $0x60] sm:$0xf]  ;;  %v1500_v33 = vld [vmem:[%s2207_s4 + $0x64] sm:$0xf0] }
   0x8   :  { %v1466_v31 = vor.u32 %v1517_v29, %v1463_v30  ;;  %v1453_v34 = vld [vmem:[%s2207_s4 + $0xe0] sm:$0xf]  ;;  %v1390_v35 = vor.u32 %v1500_v33, %v1389_v32  ;;  %v1516_v36 = vld [vmem:[%s2207_s4 + $0xe4] sm:$0xf0]  ;;  %v1477_v39 = vld [vmem:[%s2209_s1 + $0x10] sm:$0xff] }
   0x9   :  { %v1454_v37 = vor.u32 %v1516_v36, %v1453_v34  ;;  %v1468_v38 = vld [vmem:[%s2208_s0 + $0x8] sm:$0xff]  ;;  %v1499_v40 = vld [vmem:[%s2207_s4 + $0x64] sm:$0xf]  ;;  %v1381_v45 = vld [vmem:[%s2207_s4 + $0x50] sm:$0xf] }
   0xa   :  { %230 = vmatpush.bf16.msra.mxu0 %v1294_v18  ;;  %1520 = vmatpush.bf16.msra.mxu2 %v1294_v18  ;;  %v1391_v41 = vld [vmem:[%s2207_s4 + $0x68] sm:$0xf0]  ;;  %v1515_v43 = vld [vmem:[%s2207_s4 + $0xe4] sm:$0xf]  ;;  %v1498_v47 = vld [vmem:[%s2207_s4 + $0x54] sm:$0xf0] }
   0xb   :  { %319 = vmatpush.bf16.msra.mxu1 %v1298_v20  ;;  %1522 = vmatpush.bf16.msra.mxu3 %v1298_v20  ;;  %v1663_v42 = vor.u32 %v1499_v40, %v1391_v41  ;;  %v1455_v44 = vld [vmem:[%s2207_s4 + $0xe8] sm:$0xf0]  ;;  %v1445_v48 = vld [vmem:[%s2207_s4 + $0xd0] sm:$0xf]  ;;  %v1514_v49 = vld [vmem:[%s2207_s4 + $0xd4] sm:$0xf0]  ;;  %v1382_v50 = vor.u32 %v1498_v47, %v1381_v45 }
   0xc   :  { %v1458_v46 = vor.u32 %v1515_v43, %v1455_v44  ;;  %v1446_v51 = vor.u32 %v1514_v49, %v1445_v48  ;;  %v1469_v52 = vld [vmem:[%s2208_s0 + $0x10] sm:$0xff]  ;;  %v1478_v53 = vld [vmem:[%s2209_s1 + $0x18] sm:$0xff]  ;;  %v1373_v59 = vld [vmem:[%s2207_s4 + $0x40] sm:$0xf] }
   0xd   :  { %1307 = vmatmul.msk.bf16.vlgmr.msra.gmra.mxu0 %vm164_vm2, %v1467_v25  ;;  %1316 = vmatmul.msk.bf16.vlgmr.msra.gmra.mxu2 %vm164_vm2, %v1476_v26  ;;  %v1497_v54 = vld [vmem:[%s2207_s4 + $0x54] sm:$0xf]  ;;  %v1383_v55 = vld [vmem:[%s2207_s4 + $0x58] sm:$0xf0]  ;;  %v1496_v61 = vld [vmem:[%s2207_s4 + $0x44] sm:$0xf0] }
   0xe   :  { %695 = vmatpush.bf16.msrb.mxu2 %v1398_v21  ;;  %1323 = vmatmul.msk.bf16.vlgmr.msra.gmra.mxu1 %vm164_vm2, %v1467_v25  ;;  %v1700_v56 = vor.u32 %v1497_v54, %v1383_v55  ;;  %v1513_v57 = vld [vmem:[%s2207_s4 + $0xd4] sm:$0xf]  ;;  %v1447_v58 = vld [vmem:[%s2207_s4 + $0xd8] sm:$0xf0]  ;;  %v1437_v62 = vld [vmem:[%s2207_s4 + $0xc0] sm:$0xf]  ;;  %v1374_v0 = vor.u32 %v1496_v61, %v1373_v59 }
   0xf   :  { %784 = vmatpush.bf16.msrb.mxu3 %v1462_v22  ;;  %873 = vmatpush.bf16.msrb.mxu0 %v1621_v28  ;;  %v1450_v60 = vor.u32 %v1513_v57, %v1447_v58  ;;  %v1512_v63 = vld [vmem:[%s2207_s4 + $0xc4] sm:$0xf0]  ;;  %v1470_v2 = vld [vmem:[%s2208_s0 + $0x18] sm:$0xff]  ;;  %v1479_v3 = vld [vmem:[%s2209_s1 + $0x20] sm:$0xff] }
  0x10   :  { %1331 = vmatmul.msk.bf16.vlgmr.msra.gmra.mxu3 %vm164_vm2, %v1619_v27  ;;  %962 = vmatpush.bf16.msrb.mxu1 %v1466_v31  ;;  %v1438_v1 = vor.u32 %v1512_v63, %v1437_v62  ;;  %v1365_v4 = vld [vmem:[%s2207_s4 + $0x30] sm:$0xf]  ;;  %v1494_v5 = vld [vmem:[%s2207_s4 + $0x34] sm:$0xf0]  ;;  %v1495_v7 = vld [vmem:[%s2207_s4 + $0x44] sm:$0xf] }
  0x11   :  { %v1366_v6 = vor.u32 %v1494_v5, %v1365_v4  ;;  %v1375_v8 = vld [vmem:[%s2207_s4 + $0x48] sm:$0xf0]  ;;  %v1511_v9 = vld [vmem:[%s2207_s4 + $0xc4] sm:$0xf]  ;;  %v1429_v12 = vld [vmem:[%s2207_s4 + $0xb0] sm:$0xf] }
  0x12   :  { %696 = vmatpush.bf16.msrb.mxu2 %v1390_v35  ;;  %v1746_v10 = vor.u32 %v1495_v7, %v1375_v8  ;;  %v1439_v11 = vld [vmem:[%s2207_s4 + $0xc8] sm:$0xf0]  ;;  %v1510_v13 = vld [vmem:[%s2207_s4 + $0xb4] sm:$0xf0]  ;;  %v1471_v16 = vld [vmem:[%s2208_s0 + $0x20] sm:$0xff] }
  0x13   :  { %785 = vmatpush.bf16.msrb.mxu3 %v1454_v37  ;;  %874 = vmatpush.bf16.msrb.mxu0 %v1663_v42  ;;  %v1442_v14 = vor.u32 %v1511_v9, %v1439_v11  ;;  %v1430_v15 = vor.u32 %v1510_v13, %v1429_v12  ;;  %v1480_v17 = vld [vmem:[%s2209_s1 + $0x28] sm:$0xff]  ;;  %v1357_v18 = vld [vmem:[%s2207_s4 + $0x20] sm:$0xf]  ;;  %v1509_v21 = vld [vmem:[%s2207_s4 + $0xb4] sm:$0xf] }
  0x14   :  { %963 = vmatpush.bf16.msrb.mxu1 %v1458_v46  ;;  %v1492_v19 = vld [vmem:[%s2207_s4 + $0x24] sm:$0xf0]  ;;  %v1431_v22 = vld [vmem:[%s2207_s4 + $0xb8] sm:$0xf0]  ;;  %v1493_v23 = vld [vmem:[%s2207_s4 + $0x34] sm:$0xf] }
  0x15   :  { %v1358_v20 = vor.u32 %v1492_v19, %v1357_v18  ;;  %v1434_v24 = vor.u32 %v1509_v21, %v1431_v22  ;;  %v1367_v25 = vld [vmem:[%s2207_s4 + $0x38] sm:$0xf0]  ;;  %v1508_v29 = vld [vmem:[%s2207_s4 + $0xa4] sm:$0xf0]  ;;  %v1481_v33 = vld [vmem:[%s2209_s1 + $0x30] sm:$0xff] }
  0x16   :  { %697 = vmatpush.bf16.msrb.mxu2 %v1382_v50  ;;  %v1792_v30 = vor.u32 %v1493_v23, %v1367_v25  ;;  %v1472_v32 = vld [vmem:[%s2208_s0 + $0x28] sm:$0xff]  ;;  %v1349_v34 = vld [vmem:[%s2207_s4 + $0x10] sm:$0xf]  ;;  %v1490_v35 = vld [vmem:[%s2207_s4 + $0x14] sm:$0xf0] }
  0x17   :  { %786 = vmatpush.bf16.msrb.mxu3 %v1446_v51  ;;  %875 = vmatpush.bf16.msrb.mxu0 %v1700_v56  ;;  %v1350_v36 = vor.u32 %v1490_v35, %v1349_v34  ;;  %v1507_v37 = vld [vmem:[%s2207_s4 + $0xa4] sm:$0xf]  ;;  %v1359_v41 = vld [vmem:[%s2207_s4 + $0x28] sm:$0xf0]  ;;  %v1473_v44 = vld [vmem:[%s2208_s0 + $0x30] sm:$0xff] }
  0x18   :  { %964 = vmatpush.bf16.msrb.mxu1 %v1450_v60  ;;  %v1482_v45 = vld [vmem:[%s2209_s1 + $0x38] sm:$0xff]  ;;  %v1341_v46 = vld [vmem:[%s2207_s4] sm:$0xf]  ;;  %v1488_v47 = vld [vmem:[%s2207_s4 + $0x4] sm:$0xf0] }
  0x19   :  { %v1413_v48 = vld [vmem:[%s2207_s4 + $0x90] sm:$0xf]  ;;  %v1342_v49 = vor.u32 %v1488_v47, %v1341_v46  ;;  %v1506_v50 = vld [vmem:[%s2207_s4 + $0x94] sm:$0xf0]  ;;  %v1505_v51 = vld [vmem:[%s2207_s4 + $0x94] sm:$0xf] }
  0x1a   :  { %698 = vmatpush.bf16.msrb.mxu2 %v1374_v0  ;;  %v1405_v55 = vld [vmem:[%s2207_s4 + $0x80] sm:$0xf]  ;;  %v1504_v57 = vld [vmem:[%s2207_s4 + $0x84] sm:$0xf0]  ;;  %v1489_v58 = vld [vmem:[%s2207_s4 + $0x14] sm:$0xf] }
  0x1b   :  { %787 = vmatpush.bf16.msrb.mxu3 %v1438_v1  ;;  %876 = vmatpush.bf16.msrb.mxu0 %v1746_v10  ;;  %v1406_v59 = vor.u32 %v1504_v57, %v1405_v55  ;;  %v1351_v60 = vld [vmem:[%s2207_s4 + $0x18] sm:$0xf0]  ;;  %v1407_v61 = vld [vmem:[%s2207_s4 + $0x88] sm:$0xf0]  ;;  %v1487_v0 = vld [vmem:[%s2207_s4 + $0x4] sm:$0xf] }
  0x1c   :  { %965 = vmatpush.bf16.msrb.mxu1 %v1442_v14  ;;  %v1354_v62 = vor.u32 %v1489_v58, %v1351_v60  ;;  %v1343_v1 = vld [vmem:[%s2207_s4 + $0x8] sm:$0xf0] }
  0x1d   :  { %1308 = vmatmul.msk.bf16.gmra.mxu0 %vm164_vm2, %v1468_v38  ;;  %1317 = vmatmul.msk.bf16.gmra.mxu2 %vm164_vm2, %v1477_v39 }
  0x1e   :  { %1324 = vmatmul.msk.bf16.gmra.mxu1 %vm164_vm2, %v1468_v38  ;;  %699 = vmatpush.bf16.msrb.mxu2 %v1366_v6  ;;  %v1423_v38 = vld [vmem:[%s2207_s4 + $0xa8] sm:$0xf0] }
  0x1f   :  { %788 = vmatpush.bf16.msrb.mxu3 %v1430_v15  ;;  %877 = vmatpush.bf16.msrb.mxu0 %v1792_v30  ;;  %v1426_v40 = vor.u32 %v1507_v37, %v1423_v38 }
  0x20   :  { %1332 = vmatmul.msk.bf16.gmra.mxu3 %vm164_vm2, %v1476_v26  ;;  %v1421_v26 = vld [vmem:[%s2207_s4 + $0xa0] sm:$0xf]  ;;  %966 = vmatpush.bf16.msrb.mxu1 %v1434_v24 }
  0x21   :  { %v1422_v31 = vor.u32 %v1508_v29, %v1421_v26 }
  0x22   :  { %700 = vmatpush.bf16.msrb.mxu2 %v1358_v20 }
  0x23   :  { %789 = vmatpush.bf16.msrb.mxu3 %v1422_v31 }
  0x24   :  { %967 = vmatpush.bf16.msrb.mxu1 %v1426_v40 }
  0x26   :  { %701 = vmatpush.bf16.msrb.mxu2 %v1350_v36 }
  0x2a   :  { %702 = vmatpush.bf16.msrb.mxu2 %v1342_v49 }
  0x2d   :  { %1309 = vmatmul.msk.bf16.gmra.mxu0 %vm164_vm2, %v1469_v52  ;;  %1318 = vmatmul.msk.bf16.gmra.mxu2 %vm164_vm2, %v1478_v53 }
  0x2e   :  { %1325 = vmatmul.msk.bf16.gmra.mxu1 %vm164_vm2, %v1469_v52  ;;  %v1415_v52 = vld [vmem:[%s2207_s4 + $0x98] sm:$0xf0]  ;;  %1523 = vmatpush.bf16.msra.mxu2 %v1621_v28  ;;  %v1503_v28 = vld [vmem:[%s2207_s4 + $0x84] sm:$0xf] }
  0x2f   :  { %v1418_v54 = vor.u32 %v1505_v51, %v1415_v52  ;;  %v1410_v63 = vor.u32 %v1503_v28, %v1407_v61 }
  0x30   :  { %1333 = vmatmul.msk.bf16.gmra.mxu3 %vm164_vm2, %v1477_v39  ;;  %v1491_v39 = vld [vmem:[%s2207_s4 + $0x24] sm:$0xf] }
  0x31   :  { %v1362_v43 = vor.u32 %v1491_v39, %v1359_v41  ;;  %968 = vmatpush.bf16.msrb.mxu1 %v1418_v54 }
  0x32   :  { %1524 = vmatpush.bf16.msra.mxu2 %v1663_v42  ;;  %v140_v42 = vld [vmem:[%s2210_s3] sm:$0x3] }
  0x33   :  { %878 = vmatpush.bf16.msrb.mxu0 %v1362_v43  ;;  %v1891_v6 = vperm.slane %v140_v42, 0 }
  0x35   :  { %969 = vmatpush.bf16.msrb.mxu1 %v1410_v63 }
  0x36   :  { %1525 = vmatpush.bf16.msra.mxu2 %v1700_v56  ;;  %v1889_v56 = vperm.slane %v140_v42, 1 }
  0x37   :  { %879 = vmatpush.bf16.msrb.mxu0 %v1354_v62 }
  0x3a   :  { %1526 = vmatpush.bf16.msra.mxu2 %v1746_v10 }
  0x3d   :  { %1310 = vmatmul.msk.bf16.gmra.mxu0 %vm164_vm2, %v1470_v2  ;;  %1319 = vmatmul.msk.bf16.gmra.mxu2 %vm164_vm2, %v1479_v3 }
  0x3e   :  { %1326 = vmatmul.msk.bf16.gmra.mxu1 %vm164_vm2, %v1470_v2  ;;  %v1474_v2 = vld [vmem:[%s2208_s0 + $0x38] sm:$0xff]  ;;  %1527 = vmatpush.bf16.msra.mxu2 %v1792_v30 }
  0x40   :  { %1334 = vmatmul.msk.bf16.gmra.mxu3 %vm164_vm2, %v1478_v53  ;;  %v1414_v53 = vor.u32 %v1506_v50, %v1413_v48 }
  0x42   :  { %790 = vmatpush.bf16.msrb.mxu3 %v1414_v53  ;;  %1528 = vmatpush.bf16.msra.mxu2 %v1362_v43 }
  0x46   :  { %791 = vmatpush.bf16.msrb.mxu3 %v1406_v59  ;;  %1529 = vmatpush.bf16.msra.mxu2 %v1354_v62 }
  0x4d   :  { %1311 = vmatmul.msk.bf16.gmra.mxu0 %vm164_vm2, %v1471_v16  ;;  %1320 = vmatmul.msk.bf16.gmra.mxu2 %vm164_vm2, %v1480_v17 }
  0x4e   :  { %1327 = vmatmul.msk.bf16.gmra.mxu1 %vm164_vm2, %v1471_v16 }
  0x50   :  { %1335 = vmatmul.msk.bf16.gmra.mxu3 %vm164_vm2, %v1479_v3  ;;  %v1346_v3 = vor.u32 %v1487_v0, %v1343_v1 }
  0x52   :  { %880 = vmatpush.bf16.msrb.mxu0 %v1346_v3  ;;  %1530 = vmatpush.bf16.msra.mxu2 %v1346_v3 }
  0x5d   :  { %1312 = vmatmul.msk.bf16.gmra.mxu0 %vm164_vm2, %v1472_v32  ;;  %1321 = vmatmul.msk.bf16.gmra.mxu2 %vm164_vm2, %v1481_v33 }
  0x5e   :  { %1328 = vmatmul.msk.bf16.gmra.mxu1 %vm164_vm2, %v1472_v32 }
  0x60   :  { %1336 = vmatmul.msk.bf16.gmra.mxu3 %vm164_vm2, %v1480_v17 }
  0x6d   :  { %1313 = vmatmul.msk.bf16.gmra.mxu0 %vm164_vm2, %v1473_v44  ;;  %1322 = vmatmul.msk.bf16.gmra.mxu2 %vm164_vm2, %v1482_v45 }
  0x6e   :  { %1329 = vmatmul.msk.bf16.gmra.mxu1 %vm164_vm2, %v1473_v44 }
  0x70   :  { %1337 = vmatmul.msk.bf16.gmra.mxu3 %vm164_vm2, %v1481_v33 }
  0x7d   :  { %1314 = vmatmul.msk.bf16.gmra.mxu0 %vm164_vm2, %v1474_v2 }
  0x7e   :  { %1330 = vmatmul.msk.bf16.gmra.mxu1 %vm164_vm2, %v1474_v2 }
  0x80   :  { %1338 = vmatmul.msk.bf16.gmra.mxu3 %vm164_vm2, %v1482_v45 }
  0x8a   :  { %v232_v4 = vpop.f32.mrf.mxu0 }
  0x8b   :  { %v321_v5 = vpop.f32.mrf.mxu1  ;;  %v233_v8 = vadd.f32 %v232_v4, %v1891_v6 }
  0x8c   :  { %v322_v7 = vadd.f32 %v321_v5, %v1889_v56 }
  0x8d   :  { %1315 = vmatmul.msk.bf16.gmra.mxu0 %vm164_vm2, %v1619_v27  ;;  %v401_v16 = vmax.f32 %v233_v8, 0.0 }
  0x8e   :  { %v402_v14 = vmax.f32 %v322_v7, 0.0 }
  0x90   :  { %v1897_v11 = vpop.f32.mrf.mxu2 }
  0x92   :  { %v234_v10 = vpop.f32.mrf.mxu0 }
  0x93   :  { %v361_v9 = vpop.f32.mrf.mxu3  ;;  %v235_v12 = vadd.f32 %v234_v10, %v1891_v6  ;;  %v323_v13 = vpop.f32.mrf.mxu1 }
  0x94   :  { %v324_v15 = vadd.f32 %v323_v13, %v1889_v56  ;;  %v362_v27 = vadd.f32 %v361_v9, %v1889_v56 }
  0x95   :  { %v403_v17 = vmax.f32 %v235_v12, 0.0 }
  0x96   :  { %v404_v18 = vmax.f32 %v324_v15, 0.0  ;;  %v434_v23 = vmax.f32 %v362_v27, 0.0 }
  0x97   :  { %v465_v19 = vpack.c.bf16 %v403_v17, %v401_v16 }
  0x98   :  { %v466_v20 = vpack.c.bf16 %v404_v18, %v402_v14  ;;  %v1903_v29 = vpop.f32.mrf.mxu2 }
  0x99   :  { %703 = vmatmul.bf16.vlgmr.msrb.gmra.mxu2 %v465_v19 }
  0x9a   :  { %792 = vmatmul.bf16.vlgmr.msrb.gmra.mxu3 %v466_v20  ;;  %970 = vmatmul.bf16.vlgmr.msrb.gmra.mxu1 %v466_v20  ;;  %v237_v22 = vpop.f32.mrf.mxu0 }
  0x9b   :  { %v363_v21 = vpop.f32.mrf.mxu3  ;;  %v326_v25 = vpop.f32.mrf.mxu1  ;;  %v238_v32 = vadd.f32 %v237_v22, %v1891_v6 }
  0x9c   :  { %v364_v24 = vadd.f32 %v363_v21, %v1889_v56  ;;  %v327_v31 = vadd.f32 %v326_v25, %v1889_v56 }
  0x9d   :  { %881 = vmatmul.bf16.vlgmr.msrb.gmra.mxu0 %v465_v19  ;;  %v405_v39 = vmax.f32 %v238_v32, 0.0 }
  0x9e   :  { %v436_v26 = vmax.f32 %v364_v24, 0.0  ;;  %v406_v37 = vmax.f32 %v327_v31, 0.0 }
  0xa0   :  { %v1905_v30 = vpack.c.bf16 %v436_v26, %v434_v23  ;;  %v1912_v44 = vpop.f32.mrf.mxu2 }
  0xa2   :  { %v239_v34 = vpop.f32.mrf.mxu0 }
  0xa3   :  { %v366_v33 = vpop.f32.mrf.mxu3  ;;  %v240_v35 = vadd.f32 %v239_v34, %v1891_v6  ;;  %v328_v36 = vpop.f32.mrf.mxu1 }
  0xa4   :  { %v329_v38 = vadd.f32 %v328_v36, %v1889_v56  ;;  %v367_v43 = vadd.f32 %v366_v33, %v1889_v56 }
  0xa5   :  { %v407_v40 = vmax.f32 %v240_v35, 0.0 }
  0xa6   :  { %v408_v41 = vmax.f32 %v329_v38, 0.0  ;;  %v438_v49 = vmax.f32 %v367_v43, 0.0 }
  0xa7   :  { %v467_v45 = vpack.c.bf16 %v407_v40, %v405_v39 }
  0xa8   :  { %v468_v46 = vpack.c.bf16 %v408_v41, %v406_v37  ;;  %v1918_v55 = vpop.f32.mrf.mxu2 }
  0xa9   :  { %708 = vmatmul.bf16.gmra.mxu2 %v467_v45 }
  0xaa   :  { %797 = vmatmul.bf16.gmra.mxu3 %v468_v46  ;;  %975 = vmatmul.bf16.gmra.mxu1 %v468_v46  ;;  %v242_v48 = vpop.f32.mrf.mxu0 }
  0xab   :  { %v368_v47 = vpop.f32.mrf.mxu3  ;;  %v331_v51 = vpop.f32.mrf.mxu1  ;;  %v243_v57 = vadd.f32 %v242_v48, %v1891_v6 }
  0xac   :  { %v369_v50 = vadd.f32 %v368_v47, %v1889_v56  ;;  %v332_v54 = vadd.f32 %v331_v51, %v1889_v56 }
  0xad   :  { %886 = vmatmul.bf16.gmra.mxu0 %v467_v45  ;;  %v409_v63 = vmax.f32 %v243_v57, 0.0 }
  0xae   :  { %v440_v52 = vmax.f32 %v369_v50, 0.0  ;;  %v410_v61 = vmax.f32 %v332_v54, 0.0 }
  0xb0   :  { %v1915_v53 = vpack.c.bf16 %v440_v52, %v438_v49  ;;  %v1924_v8 = vpop.f32.mrf.mxu2 }
  0xb2   :  { %v244_v59 = vpop.f32.mrf.mxu0 }
  0xb3   :  { %v371_v58 = vpop.f32.mrf.mxu3  ;;  %v245_v60 = vadd.f32 %v244_v59, %v1891_v6  ;;  %v333_v28 = vpop.f32.mrf.mxu1 }
  0xb4   :  { %v334_v62 = vadd.f32 %v333_v28, %v1889_v56  ;;  %v372_v2 = vadd.f32 %v371_v58, %v1889_v56 }
  0xb5   :  { %v411_v0 = vmax.f32 %v245_v60, 0.0 }
  0xb6   :  { %v412_v1 = vmax.f32 %v334_v62, 0.0  ;;  %v442_v7 = vmax.f32 %v372_v2, 0.0 }
  0xb7   :  { %v469_v3 = vpack.c.bf16 %v411_v0, %v409_v63 }
  0xb8   :  { %v470_v42 = vpack.c.bf16 %v412_v1, %v410_v61  ;;  %v1933_v21 = vpop.f32.mrf.mxu2 }
  0xb9   :  { %713 = vmatmul.bf16.gmra.mxu2 %v469_v3 }
  0xba   :  { %802 = vmatmul.bf16.gmra.mxu3 %v470_v42  ;;  %980 = vmatmul.bf16.gmra.mxu1 %v470_v42  ;;  %v247_v5 = vpop.f32.mrf.mxu0 }
  0xbb   :  { %v373_v4 = vpop.f32.mrf.mxu3  ;;  %v336_v10 = vpop.f32.mrf.mxu1  ;;  %v248_v15 = vadd.f32 %v247_v5, %v1891_v6 }
  0xbc   :  { %v374_v9 = vadd.f32 %v373_v4, %v1889_v56  ;;  %v337_v14 = vadd.f32 %v336_v10, %v1889_v56 }
  0xbd   :  { %891 = vmatmul.bf16.gmra.mxu0 %v469_v3  ;;  %v413_v22 = vmax.f32 %v248_v15, 0.0 }
  0xbe   :  { %v444_v12 = vmax.f32 %v374_v9, 0.0  ;;  %v414_v19 = vmax.f32 %v337_v14, 0.0 }
  0xc0   :  { %v1927_v13 = vpack.c.bf16 %v444_v12, %v442_v7  ;;  %v1937_v38 = vpop.f32.mrf.mxu2 }
  0xc2   :  { %v249_v17 = vpop.f32.mrf.mxu0 }
  0xc3   :  { %v376_v16 = vpop.f32.mrf.mxu3  ;;  %v250_v18 = vadd.f32 %v249_v17, %v1891_v6  ;;  %v338_v27 = vpop.f32.mrf.mxu1 }
  0xc4   :  { %v339_v20 = vadd.f32 %v338_v27, %v1889_v56  ;;  %v377_v25 = vadd.f32 %v376_v16, %v1889_v56 }
  0xc5   :  { %v415_v23 = vmax.f32 %v250_v18, 0.0 }
  0xc6   :  { %v416_v24 = vmax.f32 %v339_v20, 0.0  ;;  %v446_v34 = vmax.f32 %v377_v25, 0.0 }
  0xc7   :  { %v471_v26 = vpack.c.bf16 %v415_v23, %v413_v22 }
  0xc8   :  { %v472_v31 = vpack.c.bf16 %v416_v24, %v414_v19  ;;  %v1946_v59 = vpop.f32.mrf.mxu2 }
  0xc9   :  { %718 = vmatmul.bf16.gmra.mxu2 %v471_v26 }
  0xca   :  { %807 = vmatmul.bf16.gmra.mxu3 %v472_v31  ;;  %985 = vmatmul.bf16.gmra.mxu1 %v472_v31  ;;  %v252_v33 = vpop.f32.mrf.mxu0 }
  0xcb   :  { %v378_v32 = vpop.f32.mrf.mxu3  ;;  %v341_v36 = vpop.f32.mrf.mxu1  ;;  %v253_v41 = vadd.f32 %v252_v33, %v1891_v6 }
  0xcc   :  { %v379_v35 = vadd.f32 %v378_v32, %v1889_v56  ;;  %v342_v40 = vadd.f32 %v341_v36, %v1889_v56 }
  0xcd   :  { %896 = vmatmul.bf16.gmra.mxu0 %v471_v26  ;;  %v417_v50 = vmax.f32 %v253_v41, 0.0 }
  0xce   :  { %v448_v37 = vmax.f32 %v379_v35, 0.0  ;;  %v418_v48 = vmax.f32 %v342_v40, 0.0 }
  0xd0   :  { %v1939_v39 = vpack.c.bf16 %v448_v37, %v446_v34  ;;  %v1953_v5 = vpop.f32.mrf.mxu2 }
  0xd2   :  { %v254_v45 = vpop.f32.mrf.mxu0 }
  0xd3   :  { %v381_v43 = vpop.f32.mrf.mxu3  ;;  %v255_v46 = vadd.f32 %v254_v45, %v1891_v6  ;;  %v343_v47 = vpop.f32.mrf.mxu1 }
  0xd4   :  { %v344_v49 = vadd.f32 %v343_v47, %v1889_v56  ;;  %v382_v54 = vadd.f32 %v381_v43, %v1889_v56 }
  0xd5   :  { %v419_v51 = vmax.f32 %v255_v46, 0.0 }
  0xd6   :  { %v420_v52 = vmax.f32 %v344_v49, 0.0  ;;  %v450_v61 = vmax.f32 %v382_v54, 0.0 }
  0xd7   :  { %v473_v57 = vpack.c.bf16 %v419_v51, %v417_v50 }
  0xd8   :  { %v474_v58 = vpack.c.bf16 %v420_v52, %v418_v48  ;;  %v1959_v25 = vpop.f32.mrf.mxu2 }
  0xd9   :  { %723 = vmatmul.bf16.gmra.mxu2 %v473_v57 }
  0xda   :  { %812 = vmatmul.bf16.gmra.mxu3 %v474_v58  ;;  %990 = vmatmul.bf16.gmra.mxu1 %v474_v58  ;;  %v257_v28 = vpop.f32.mrf.mxu0 }
  0xdb   :  { %v383_v60 = vpop.f32.mrf.mxu3  ;;  %v346_v63 = vpop.f32.mrf.mxu1  ;;  %v258_v3 = vadd.f32 %v257_v28, %v1891_v6 }
  0xdc   :  { %v384_v62 = vadd.f32 %v383_v60, %v1889_v56  ;;  %v347_v2 = vadd.f32 %v346_v63, %v1889_v56 }
  0xdd   :  { %901 = vmatmul.bf16.gmra.mxu0 %v473_v57  ;;  %v421_v14 = vmax.f32 %v258_v3, 0.0 }
  0xde   :  { %v452_v0 = vmax.f32 %v384_v62, 0.0  ;;  %v422_v10 = vmax.f32 %v347_v2, 0.0 }
  0xe0   :  { %v1949_v1 = vpack.c.bf16 %v452_v0, %v450_v61  ;;  %v1967_v47 = vpop.f32.mrf.mxu2 }
  0xe2   :  { %v259_v4 = vpop.f32.mrf.mxu0 }
  0xe3   :  { %v386_v42 = vpop.f32.mrf.mxu3  ;;  %v260_v7 = vadd.f32 %v259_v4, %v1891_v6  ;;  %v348_v9 = vpop.f32.mrf.mxu1 }
  0xe4   :  { %v349_v12 = vadd.f32 %v348_v9, %v1889_v56  ;;  %v387_v17 = vadd.f32 %v386_v42, %v1889_v56 }
  0xe5   :  { %v423_v15 = vmax.f32 %v260_v7, 0.0 }
  0xe6   :  { %v424_v16 = vmax.f32 %v349_v12, 0.0  ;;  %v454_v22 = vmax.f32 %v387_v17, 0.0 }
  0xe7   :  { %v475_v18 = vpack.c.bf16 %v423_v15, %v421_v14 }
  0xe8   :  { %v476_v27 = vpack.c.bf16 %v424_v16, %v422_v10  ;;  %v1974_v62 = vpop.f32.mrf.mxu2 }
  0xe9   :  { %728 = vmatmul.bf16.gmra.mxu2 %v475_v18 }
  0xea   :  { %817 = vmatmul.bf16.gmra.mxu3 %v476_v27  ;;  %995 = vmatmul.bf16.gmra.mxu1 %v476_v27  ;;  %v262_v20 = vpop.f32.mrf.mxu0 }
  0xeb   :  { %v388_v19 = vpop.f32.mrf.mxu3  ;;  %v351_v24 = vpop.f32.mrf.mxu1  ;;  %v263_v33 = vadd.f32 %v262_v20, %v1891_v6 }
  0xec   :  { %v389_v23 = vadd.f32 %v388_v19, %v1889_v56  ;;  %v352_v32 = vadd.f32 %v351_v24, %v1889_v56 }
  0xed   :  { %906 = vmatmul.bf16.gmra.mxu0 %v475_v18  ;;  %v425_v43 = vmax.f32 %v263_v33, 0.0 }
  0xee   :  { %v456_v26 = vmax.f32 %v389_v23, 0.0  ;;  %v426_v40 = vmax.f32 %v352_v32, 0.0 }
  0xf0   :  { %v1961_v31 = vpack.c.bf16 %v456_v26, %v454_v22  ;;  %v1980_v18 = vpop.f32.mrf.mxu2 }
  0xf2   :  { %v264_v35 = vpop.f32.mrf.mxu0 }
  0xf3   :  { %v391_v34 = vpop.f32.mrf.mxu3  ;;  %v265_v36 = vadd.f32 %v264_v35, %v1891_v6  ;;  %v353_v37 = vpop.f32.mrf.mxu1 }
  0xf4   :  { %v354_v41 = vadd.f32 %v353_v37, %v1889_v56  ;;  %v392_v48 = vadd.f32 %v391_v34, %v1889_v56  ;;  %v529_v34 = vld [vmem:[%s2211_s5] sm:$0x3] }
  0xf5   :  { %v427_v45 = vmax.f32 %v265_v36, 0.0 }
  0xf6   :  { %v428_v46 = vmax.f32 %v354_v41, 0.0  ;;  %v458_v54 = vmax.f32 %v392_v48, 0.0  ;;  %v1994_v41 = vperm.slane %v529_v34, 0 }
  0xf7   :  { %v477_v49 = vpack.c.bf16 %v427_v45, %v425_v43 }
  0xf8   :  { %v478_v50 = vpack.c.bf16 %v428_v46, %v426_v40  ;;  %v1987_v33 = vpop.f32.mrf.mxu2 }
  0xf9   :  { %733 = vmatmul.bf16.gmra.mxu2 %v477_v49 }
  0xfa   :  { %822 = vmatmul.bf16.gmra.mxu3 %v478_v50  ;;  %1000 = vmatmul.bf16.gmra.mxu1 %v478_v50  ;;  %v267_v52 = vpop.f32.mrf.mxu0 }
  0xfb   :  { %v393_v51 = vpop.f32.mrf.mxu3  ;;  %v356_v58 = vpop.f32.mrf.mxu1  ;;  %v268_v63 = vadd.f32 %v267_v52, %v1891_v6  ;;  %v280_v52 = vadd.f32 %v1903_v29, %v1891_v6 }
  0xfc   :  { %v394_v57 = vadd.f32 %v393_v51, %v1889_v56  ;;  %v357_v61 = vadd.f32 %v356_v58, %v1889_v56  ;;  %v278_v51 = vadd.f32 %v1897_v11, %v1891_v6 }
  0xfd   :  { %911 = vmatmul.bf16.gmra.mxu0 %v477_v49  ;;  %v429_v9 = vmax.f32 %v268_v63, 0.0 }
  0xfe   :  { %v460_v60 = vmax.f32 %v394_v57, 0.0  ;;  %v430_v4 = vmax.f32 %v357_v61, 0.0  ;;  %v437_v58 = vmax.f32 %v278_v51, 0.0 }
 0x100   :  { %v1971_v28 = vpack.c.bf16 %v460_v60, %v458_v54  ;;  %v439_v60 = vmax.f32 %v280_v52, 0.0 }
 0x102   :  { %v269_v2 = vpop.f32.mrf.mxu0 }
 0x103   :  { %v396_v0 = vpop.f32.mrf.mxu3  ;;  %v270_v3 = vadd.f32 %v269_v2, %v1891_v6  ;;  %v358_v42 = vpop.f32.mrf.mxu1 }
 0x104   :  { %v359_v7 = vadd.f32 %v358_v42, %v1889_v56  ;;  %v397_v14 = vadd.f32 %v396_v0, %v1889_v56 }
 0x105   :  { %v431_v10 = vmax.f32 %v270_v3, 0.0 }
 0x106   :  { %v432_v12 = vmax.f32 %v359_v7, 0.0  ;;  %v462_v19 = vmax.f32 %v397_v14, 0.0 }
 0x107   :  { %v479_v15 = vpack.c.bf16 %v431_v10, %v429_v9 }
 0x108   :  { %v480_v16 = vpack.c.bf16 %v432_v12, %v430_v4  ;;  %v483_v4 = vpack.c.bf16 %v439_v60, %v437_v58 }
 0x109   :  { %738 = vmatmul.bf16.gmra.mxu2 %v479_v15 }
 0x10a   :  { %827 = vmatmul.bf16.gmra.mxu3 %v480_v16  ;;  %1005 = vmatmul.bf16.gmra.mxu1 %v480_v16  ;;  %v272_v27 = vpop.f32.mrf.mxu0  ;;  %v285_v16 = vadd.f32 %v1918_v55, %v1891_v6 }
 0x10b   :  { %v398_v17 = vpop.f32.mrf.mxu3  ;;  %v273_v24 = vadd.f32 %v272_v27, %v1891_v6 }
 0x10c   :  { %v399_v20 = vadd.f32 %v398_v17, %v1889_v56  ;;  %v1992_v56 = vperm.slane %v529_v34, 1 }
 0x10d   :  { %916 = vmatmul.bf16.gmra.mxu0 %v479_v15  ;;  %v433_v35 = vmax.f32 %v273_v24, 0.0  ;;  %v283_v15 = vadd.f32 %v1912_v44, %v1891_v6 }
 0x10e   :  { %v464_v22 = vmax.f32 %v399_v20, 0.0  ;;  %v443_v20 = vmax.f32 %v285_v16, 0.0 }
 0x110   :  { %v1983_v23 = vpack.c.bf16 %v464_v22, %v462_v19  ;;  %v441_v19 = vmax.f32 %v283_v15, 0.0  ;;  %v295_v15 = vadd.f32 %v1946_v59, %v1891_v6 }
 0x112   :  { %v274_v26 = vpop.f32.mrf.mxu0 }
 0x113   :  { %v275_v32 = vadd.f32 %v274_v26, %v1891_v6 }
 0x115   :  { %v435_v36 = vmax.f32 %v275_v32, 0.0 }
 0x117   :  { %v971_v37 = vpop.f32.mrf.mxu1  ;;  %v481_v40 = vpack.c.bf16 %v435_v36, %v433_v35  ;;  %v485_v36 = vpack.c.bf16 %v443_v20, %v441_v19  ;;  %v451_v19 = vmax.f32 %v295_v15, 0.0  ;;  %v303_v15 = vadd.f32 %v1967_v47, %v1891_v6 }
 0x119   :  { %743 = vmatmul.bf16.gmra.mxu2 %v481_v40 }
 0x11a   :  { %832 = vmatmul.bf16.gmra.mxu3 %v1905_v30  ;;  %1010 = vmatmul.bf16.gmra.mxu1 %v1905_v30  ;;  %v882_v43 = vpop.f32.mrf.mxu0 }
 0x11b   :  { %v883_v45 = vadd.f32 %v882_v43, %v1992_v56 }
 0x11c   :  { %v704_v46 = vpop.f32.mrf.mxu2 }
 0x11d   :  { %v1999_v48 = vadd.f32 %v971_v37, %v883_v45  ;;  %v705_v49 = vadd.f32 %v704_v46, %v1994_v41  ;;  %v793_v50 = vpop.f32.mrf.mxu3  ;;  %921 = vmatmul.bf16.gmra.mxu0 %v481_v40 }
 0x11f   :  { %v2006_v54 = vadd.f32 %v793_v50, %v705_v49  ;;  %v973_v57 = vpop.f32.mrf.mxu1  ;;  %v288_v49 = vadd.f32 %v1924_v8, %v1891_v6  ;;  %v290_v50 = vadd.f32 %v1933_v21, %v1891_v6 }
 0x122   :  { %v884_v30 = vpop.f32.mrf.mxu0 }
 0x123   :  { %v885_v61 = vadd.f32 %v884_v30, %v1992_v56  ;;  %v447_v30 = vmax.f32 %v290_v50, 0.0  ;;  %v300_v50 = vadd.f32 %v1959_v25, %v1891_v6 }
 0x124   :  { %v706_v63 = vpop.f32.mrf.mxu2 }
 0x125   :  { %v2009_v0 = vadd.f32 %v973_v57, %v885_v61  ;;  %v707_v2 = vadd.f32 %v706_v63, %v1994_v41  ;;  %v795_v3 = vpop.f32.mrf.mxu3  ;;  %v445_v57 = vmax.f32 %v288_v49, 0.0  ;;  %v298_v49 = vadd.f32 %v1953_v5, %v1891_v6 }
 0x127   :  { %v2012_v42 = vadd.f32 %v795_v3, %v707_v2  ;;  %v976_v11 = vpop.f32.mrf.mxu1 }
 0x129   :  { %748 = vmatmul.bf16.gmra.mxu2 %v483_v4 }
 0x12a   :  { %837 = vmatmul.bf16.gmra.mxu3 %v1915_v53  ;;  %1015 = vmatmul.bf16.gmra.mxu1 %v1915_v53  ;;  %v887_v29 = vpop.f32.mrf.mxu0 }
 0x12b   :  { %v888_v7 = vadd.f32 %v887_v29, %v1992_v56 }
 0x12c   :  { %v709_v9 = vpop.f32.mrf.mxu2 }
 0x12d   :  { %v2017_v10 = vadd.f32 %v976_v11, %v888_v7  ;;  %v710_v12 = vadd.f32 %v709_v9, %v1994_v41  ;;  %v798_v14 = vpop.f32.mrf.mxu3  ;;  %926 = vmatmul.bf16.gmra.mxu0 %v483_v4  ;;  %v487_v11 = vpack.c.bf16 %v447_v30, %v445_v57  ;;  %v453_v57 = vmax.f32 %v298_v49, 0.0 }
 0x12e   :  { %v455_v30 = vmax.f32 %v300_v50, 0.0 }
 0x12f   :  { %v2024_v17 = vadd.f32 %v798_v14, %v710_v12  ;;  %v978_v27 = vpop.f32.mrf.mxu1  ;;  %v293_v14 = vadd.f32 %v1937_v38, %v1891_v6 }
 0x132   :  { %v889_v53 = vpop.f32.mrf.mxu0 }
 0x133   :  { %v890_v22 = vadd.f32 %v889_v53, %v1992_v56  ;;  %v449_v53 = vmax.f32 %v293_v14, 0.0 }
 0x134   :  { %v711_v24 = vpop.f32.mrf.mxu2 }
 0x135   :  { %v2027_v26 = vadd.f32 %v978_v27, %v890_v22  ;;  %v712_v32 = vadd.f32 %v711_v24, %v1994_v41  ;;  %v800_v34 = vpop.f32.mrf.mxu3 }
 0x137   :  { %v2030_v35 = vadd.f32 %v800_v34, %v712_v32  ;;  %v981_v44 = vpop.f32.mrf.mxu1 }
 0x139   :  { %753 = vmatmul.bf16.gmra.mxu2 %v485_v36 }
 0x13a   :  { %842 = vmatmul.bf16.gmra.mxu3 %v1927_v13  ;;  %1020 = vmatmul.bf16.gmra.mxu1 %v1927_v13  ;;  %v892_v55 = vpop.f32.mrf.mxu0 }
 0x13b   :  { %v893_v37 = vadd.f32 %v892_v55, %v1992_v56 }
 0x13c   :  { %v714_v40 = vpop.f32.mrf.mxu2 }
 0x13d   :  { %v2035_v43 = vadd.f32 %v981_v44, %v893_v37  ;;  %v715_v45 = vadd.f32 %v714_v40, %v1994_v41  ;;  %v803_v46 = vpop.f32.mrf.mxu3  ;;  %931 = vmatmul.bf16.gmra.mxu0 %v485_v36  ;;  %v489_v36 = vpack.c.bf16 %v451_v19, %v449_v53  ;;  %v457_v19 = vmax.f32 %v303_v15, 0.0 }
 0x13f   :  { %v2042_v51 = vadd.f32 %v803_v46, %v715_v45  ;;  %v983_v52 = vpop.f32.mrf.mxu1 }
 0x142   :  { %v894_v13 = vpop.f32.mrf.mxu0 }
 0x143   :  { %v895_v58 = vadd.f32 %v894_v13, %v1992_v56 }
 0x144   :  { %v716_v60 = vpop.f32.mrf.mxu2 }
 0x145   :  { %v2045_v61 = vadd.f32 %v983_v52, %v895_v58  ;;  %v717_v63 = vadd.f32 %v716_v60, %v1994_v41  ;;  %v805_v2 = vpop.f32.mrf.mxu3 }
 0x147   :  { %v2048_v3 = vadd.f32 %v805_v2, %v717_v63  ;;  %v986_v8 = vpop.f32.mrf.mxu1 }
 0x149   :  { %758 = vmatmul.bf16.gmra.mxu2 %v487_v11 }
 0x14a   :  { %847 = vmatmul.bf16.gmra.mxu3 %v1939_v39  ;;  %1025 = vmatmul.bf16.gmra.mxu1 %v1939_v39  ;;  %v897_v21 = vpop.f32.mrf.mxu0 }
 0x14b   :  { %v898_v4 = vadd.f32 %v897_v21, %v1992_v56  ;;  %v491_v21 = vpack.c.bf16 %v455_v30, %v453_v57 }
 0x14c   :  { %v719_v29 = vpop.f32.mrf.mxu2 }
 0x14d   :  { %v2053_v7 = vadd.f32 %v986_v8, %v898_v4  ;;  %v720_v9 = vadd.f32 %v719_v29, %v1994_v41  ;;  %v808_v12 = vpop.f32.mrf.mxu3  ;;  %936 = vmatmul.bf16.gmra.mxu0 %v487_v11 }
 0x14f   :  { %v2060_v16 = vadd.f32 %v808_v12, %v720_v9  ;;  %v988_v27 = vpop.f32.mrf.mxu1 }
 0x152   :  { %v899_v39 = vpop.f32.mrf.mxu0 }
 0x153   :  { %v900_v20 = vadd.f32 %v899_v39, %v1992_v56 }
 0x154   :  { %v721_v22 = vpop.f32.mrf.mxu2 }
 0x155   :  { %v2063_v24 = vadd.f32 %v988_v27, %v900_v20  ;;  %v722_v32 = vadd.f32 %v721_v22, %v1994_v41  ;;  %v810_v34 = vpop.f32.mrf.mxu3  ;;  %v305_v27 = vadd.f32 %v1974_v62, %v1891_v6 }
 0x157   :  { %v2066_v44 = vadd.f32 %v810_v34, %v722_v32  ;;  %v991_v38 = vpop.f32.mrf.mxu1  ;;  %v459_v20 = vmax.f32 %v305_v27, 0.0 }
 0x159   :  { %763 = vmatmul.bf16.gmra.mxu2 %v489_v36 }
 0x15a   :  { %852 = vmatmul.bf16.gmra.mxu3 %v1949_v1  ;;  %1030 = vmatmul.bf16.gmra.mxu1 %v1949_v1  ;;  %v902_v59 = vpop.f32.mrf.mxu0 }
 0x15b   :  { %v903_v55 = vadd.f32 %v902_v59, %v1992_v56 }
 0x15c   :  { %v724_v37 = vpop.f32.mrf.mxu2 }
 0x15d   :  { %v2071_v40 = vadd.f32 %v991_v38, %v903_v55  ;;  %v725_v45 = vadd.f32 %v724_v37, %v1994_v41  ;;  %v813_v46 = vpop.f32.mrf.mxu3  ;;  %941 = vmatmul.bf16.gmra.mxu0 %v489_v36  ;;  %v493_v55 = vpack.c.bf16 %v459_v20, %v457_v19 }
 0x15f   :  { %v2078_v52 = vadd.f32 %v813_v46, %v725_v45  ;;  %v993_v13 = vpop.f32.mrf.mxu1 }
 0x162   :  { %v904_v1 = vpop.f32.mrf.mxu0 }
 0x163   :  { %v905_v58 = vadd.f32 %v904_v1, %v1992_v56  ;;  %v310_v1 = vadd.f32 %v1987_v33, %v1891_v6 }
 0x164   :  { %v726_v60 = vpop.f32.mrf.mxu2 }
 0x165   :  { %v2081_v63 = vadd.f32 %v993_v13, %v905_v58  ;;  %v727_v2 = vadd.f32 %v726_v60, %v1994_v41  ;;  %v815_v8 = vpop.f32.mrf.mxu3  ;;  %v308_v13 = vadd.f32 %v1980_v18, %v1891_v6  ;;  %v463_v60 = vmax.f32 %v310_v1, 0.0 }
 0x167   :  { %v2084_v11 = vadd.f32 %v815_v8, %v727_v2  ;;  %v996_v5 = vpop.f32.mrf.mxu1  ;;  %v461_v58 = vmax.f32 %v308_v13, 0.0  ;;  %v1052_v13 = vmax.f32 %v1999_v48, 0.0 }
 0x169   :  { %768 = vmatmul.bf16.gmra.mxu2 %v491_v21 }
 0x16a   :  { %857 = vmatmul.bf16.gmra.mxu3 %v1961_v31  ;;  %1035 = vmatmul.bf16.gmra.mxu1 %v1961_v31  ;;  %v907_v25 = vpop.f32.mrf.mxu0 }
 0x16b   :  { %v908_v4 = vadd.f32 %v907_v25, %v1992_v56 }
 0x16c   :  { %v729_v29 = vpop.f32.mrf.mxu2 }
 0x16d   :  { %v2089_v9 = vadd.f32 %v996_v5, %v908_v4  ;;  %v730_v12 = vadd.f32 %v729_v29, %v1994_v41  ;;  %v818_v14 = vpop.f32.mrf.mxu3  ;;  %946 = vmatmul.bf16.gmra.mxu0 %v491_v21  ;;  %v495_v29 = vpack.c.bf16 %v463_v60, %v461_v58  ;;  %v1051_v58 = vmax.f32 %v2006_v54, 0.0 }
 0x16f   :  { %v2096_v39 = vadd.f32 %v818_v14, %v730_v12  ;;  %v998_v53 = vpop.f32.mrf.mxu1 }
 0x172   :  { %v909_v31 = vpop.f32.mrf.mxu0 }
 0x173   :  { %v910_v22 = vadd.f32 %v909_v31, %v1992_v56 }
 0x174   :  { %v731_v32 = vpop.f32.mrf.mxu2 }
 0x175   :  { %v2099_v34 = vadd.f32 %v998_v53, %v910_v22  ;;  %v732_v38 = vadd.f32 %v731_v32, %v1994_v41  ;;  %v820_v36 = vpop.f32.mrf.mxu3 }
 0x177   :  { %v2102_v59 = vadd.f32 %v820_v36, %v732_v38  ;;  %v1001_v47 = vpop.f32.mrf.mxu1 }
 0x179   :  { %773 = vmatmul.bf16.gmra.mxu2 %v493_v55 }
 0x17a   :  { %862 = vmatmul.bf16.gmra.mxu3 %v1971_v28  ;;  %1040 = vmatmul.bf16.gmra.mxu1 %v1971_v28  ;;  %v912_v62 = vpop.f32.mrf.mxu0 }
 0x17b   :  { %v913_v37 = vadd.f32 %v912_v62, %v1992_v56 }
 0x17c   :  { %v734_v45 = vpop.f32.mrf.mxu2 }
 0x17d   :  { %v2107_v46 = vadd.f32 %v1001_v47, %v913_v37  ;;  %v735_v49 = vadd.f32 %v734_v45, %v1994_v41  ;;  %v823_v50 = vpop.f32.mrf.mxu3  ;;  %951 = vmatmul.bf16.gmra.mxu0 %v493_v55 }
 0x17f   :  { %v2114_v57 = vadd.f32 %v823_v50, %v735_v49  ;;  %v1003_v30 = vpop.f32.mrf.mxu1 }
 0x182   :  { %v914_v28 = vpop.f32.mrf.mxu0 }
 0x183   :  { %v915_v2 = vadd.f32 %v914_v28, %v1992_v56 }
 0x184   :  { %v736_v8 = vpop.f32.mrf.mxu2 }
 0x185   :  { %v2117_v5 = vadd.f32 %v1003_v30, %v915_v2  ;;  %v737_v21 = vadd.f32 %v736_v8, %v1994_v41  ;;  %v825_v25 = vpop.f32.mrf.mxu3 }
 0x187   :  { %v2120_v4 = vadd.f32 %v825_v25, %v737_v21  ;;  %v1006_v18 = vpop.f32.mrf.mxu1 }
 0x189   :  { %778 = vmatmul.bf16.gmra.mxu2 %v495_v29 }
 0x18a   :  { %867 = vmatmul.bf16.gmra.mxu3 %v1983_v23  ;;  %1045 = vmatmul.bf16.gmra.mxu1 %v1983_v23  ;;  %v917_v6 = vpop.f32.mrf.mxu0 }
 0x18b   :  { %v918_v33 = vadd.f32 %v917_v6, %v1992_v56 }
 0x18c   :  { %v739_v12 = vpop.f32.mrf.mxu2 }
 0x18d   :  { %v2125_v14 = vadd.f32 %v1006_v18, %v918_v33  ;;  %v740_v15 = vadd.f32 %v739_v12, %v1994_v41  ;;  %v828_v27 = vpop.f32.mrf.mxu3  ;;  %v1054_v12 = vmax.f32 %v2009_v0, 0.0 }
 0x18f   :  { %v2128_v53 = vadd.f32 %v828_v27, %v740_v15  ;;  %v1008_v31 = vpop.f32.mrf.mxu1 }
 0x192   :  { %v919_v19 = vpop.f32.mrf.mxu0 }
 0x193   :  { %v920_v20 = vadd.f32 %v919_v19, %v1992_v56 }
 0x194   :  { %v741_v22 = vpop.f32.mrf.mxu2 }
 0x195   :  { %v2131_v32 = vadd.f32 %v1008_v31, %v920_v20  ;;  %v742_v23 = vadd.f32 %v741_v22, %v1994_v41  ;;  %v830_v38 = vpop.f32.mrf.mxu3  ;;  %v1053_v31 = vmax.f32 %v2012_v42, 0.0 }
 0x197   :  { %v2134_v36 = vadd.f32 %v830_v38, %v742_v23  ;;  %v1011_v47 = vpop.f32.mrf.mxu1 }
 0x199   :  { %956 = vmatmul.bf16.vlgmr.msra.gmra.mxu2 %v495_v29 }
 0x19a   :  { %v922_v55 = vpop.f32.mrf.mxu0 }
 0x19b   :  { %v923_v62 = vadd.f32 %v922_v55, %v1992_v56 }
 0x19c   :  { %v744_v37 = vpop.f32.mrf.mxu2 }
 0x19d   :  { %v1012_v45 = vadd.f32 %v1011_v47, %v923_v62  ;;  %v745_v49 = vadd.f32 %v744_v37, %v1994_v41  ;;  %v833_v50 = vpop.f32.mrf.mxu3 }
 0x19f   :  { %v1084_v1 = vmax.f32 %v1012_v45, 0.0  ;;  %v834_v30 = vadd.f32 %v833_v50, %v745_v49  ;;  %v1013_v28 = vpop.f32.mrf.mxu1 }
 0x1a1   :  { %v1116_v60 = vsub.f32 %v1052_v13, %v1084_v1  ;;  %v1083_v2 = vmax.f32 %v834_v30, 0.0  ;;  %v1056_v13 = vmax.f32 %v2017_v10, 0.0 }
 0x1a2   :  { %v924_v8 = vpop.f32.mrf.mxu0 }
 0x1a3   :  { %v1115_v21 = vsub.f32 %v1051_v58, %v1083_v2  ;;  %v925_v25 = vadd.f32 %v924_v8, %v1992_v56  ;;  %v1148_v22 = vmul.f32 %v1116_v60, %v1116_v60  ;;  %v1055_v58 = vmax.f32 %v2024_v17, 0.0 }
 0x1a4   :  { %v746_v18 = vpop.f32.mrf.mxu2 }
 0x1a5   :  { %v1014_v29 = vadd.f32 %v1013_v28, %v925_v25  ;;  %v747_v6 = vadd.f32 %v746_v18, %v1994_v41  ;;  %v835_v33 = vpop.f32.mrf.mxu3  ;;  %v1147_v55 = vmul.f32 %v1115_v21, %v1115_v21 }
 0x1a7   :  { %v1086_v15 = vmax.f32 %v1014_v29, 0.0  ;;  %v836_v48 = vadd.f32 %v835_v33, %v747_v6  ;;  %v1016_v27 = vpop.f32.mrf.mxu1 }
 0x1a9   :  { %v1118_v19 = vsub.f32 %v1054_v12, %v1086_v15  ;;  %v1085_v54 = vmax.f32 %v836_v48, 0.0  ;;  %v1058_v48 = vmax.f32 %v2027_v26, 0.0 }
 0x1aa   :  { %v927_v20 = vpop.f32.mrf.mxu0 }
 0x1ab   :  { %v1150_v23 = vmul.f32 %v1118_v19, %v1118_v19  ;;  %v1117_v38 = vsub.f32 %v1053_v31, %v1085_v54  ;;  %v928_v47 = vadd.f32 %v927_v20, %v1992_v56  ;;  %v1057_v54 = vmax.f32 %v2030_v35, 0.0 }
 0x1ac   :  { %v749_v62 = vpop.f32.mrf.mxu2 }
 0x1ad   :  { %v1200_v37 = vadd.f32 %v1150_v23, %v1148_v22  ;;  %v1149_v45 = vmul.f32 %v1117_v38, %v1117_v38  ;;  %v1017_v49 = vadd.f32 %v1016_v27, %v928_v47  ;;  %v750_v0 = vadd.f32 %v749_v62, %v1994_v41  ;;  %v838_v50 = vpop.f32.mrf.mxu3 }
 0x1af   :  { %v1179_v1 = vadd.f32 %v1149_v45, %v1147_v55  ;;  %v1088_v42 = vmax.f32 %v1017_v49, 0.0  ;;  %v839_v30 = vadd.f32 %v838_v50, %v750_v0  ;;  %v1018_v28 = vpop.f32.mrf.mxu1  ;;  %v1060_v50 = vmax.f32 %v2035_v43, 0.0 }
 0x1b1   :  { %v1120_v60 = vsub.f32 %v1056_v13, %v1088_v42  ;;  %v1087_v2 = vmax.f32 %v839_v30, 0.0  ;;  %v1059_v30 = vmax.f32 %v2042_v51, 0.0 }
 0x1b2   :  { %v929_v8 = vpop.f32.mrf.mxu0 }
 0x1b3   :  { %v1152_v25 = vmul.f32 %v1120_v60, %v1120_v60  ;;  %v1119_v21 = vsub.f32 %v1055_v58, %v1087_v2  ;;  %v930_v18 = vadd.f32 %v929_v8, %v1992_v56 }
 0x1b4   :  { %v751_v29 = vpop.f32.mrf.mxu2 }
 0x1b5   :  { %v1201_v6 = vadd.f32 %v1200_v37, %v1152_v25  ;;  %v1151_v33 = vmul.f32 %v1119_v21, %v1119_v21  ;;  %v1019_v12 = vadd.f32 %v1018_v28, %v930_v18  ;;  %v752_v15 = vadd.f32 %v751_v29, %v1994_v41  ;;  %v840_v10 = vpop.f32.mrf.mxu3 }
 0x1b7   :  { %v1180_v27 = vadd.f32 %v1179_v1, %v1151_v33  ;;  %v1090_v31 = vmax.f32 %v1019_v12, 0.0  ;;  %v841_v19 = vadd.f32 %v840_v10, %v752_v15  ;;  %v1021_v17 = vpop.f32.mrf.mxu1  ;;  %v1062_v12 = vmax.f32 %v2045_v61, 0.0 }
 0x1b9   :  { %v1122_v20 = vsub.f32 %v1058_v48, %v1090_v31  ;;  %v1089_v22 = vmax.f32 %v841_v19, 0.0 }
 0x1ba   :  { %v932_v23 = vpop.f32.mrf.mxu0 }
 0x1bb   :  { %v1154_v38 = vmul.f32 %v1122_v20, %v1122_v20  ;;  %v1121_v47 = vsub.f32 %v1057_v54, %v1089_v22  ;;  %v933_v55 = vadd.f32 %v932_v23, %v1992_v56 }
 0x1bc   :  { %v754_v62 = vpop.f32.mrf.mxu2 }
 0x1bd   :  { %v1202_v37 = vadd.f32 %v1201_v6, %v1154_v38  ;;  %v1153_v45 = vmul.f32 %v1121_v47, %v1121_v47  ;;  %v1022_v49 = vadd.f32 %v1021_v17, %v933_v55  ;;  %v755_v0 = vadd.f32 %v754_v62, %v1994_v41  ;;  %v843_v26 = vpop.f32.mrf.mxu3 }
 0x1bf   :  { %v1181_v13 = vadd.f32 %v1180_v27, %v1153_v45  ;;  %v1092_v1 = vmax.f32 %v1022_v49, 0.0  ;;  %v844_v42 = vadd.f32 %v843_v26, %v755_v0  ;;  %v1023_v35 = vpop.f32.mrf.mxu1  ;;  %v1061_v27 = vmax.f32 %v2048_v3, 0.0 }
 0x1c0   :  { %v1063_v26 = vmax.f32 %v2060_v16, 0.0 }
 0x1c1   :  { %v1124_v28 = vsub.f32 %v1060_v50, %v1092_v1  ;;  %v1091_v58 = vmax.f32 %v844_v42, 0.0 }
 0x1c2   :  { %v934_v60 = vpop.f32.mrf.mxu0 }
 0x1c3   :  { %v1156_v2 = vmul.f32 %v1124_v28, %v1124_v28  ;;  %v1123_v8 = vsub.f32 %v1059_v30, %v1091_v58  ;;  %v935_v25 = vadd.f32 %v934_v60, %v1992_v56 }
 0x1c4   :  { %v756_v21 = vpop.f32.mrf.mxu2 }
 0x1c5   :  { %v1203_v18 = vadd.f32 %v1202_v37, %v1156_v2  ;;  %v1155_v29 = vmul.f32 %v1123_v8, %v1123_v8  ;;  %v1024_v6 = vadd.f32 %v1023_v35, %v935_v25  ;;  %v757_v33 = vadd.f32 %v756_v21, %v1994_v41  ;;  %v845_v43 = vpop.f32.mrf.mxu3 }
 0x1c6   :  { %v1064_v37 = vmax.f32 %v2053_v7, 0.0  ;;  %v1066_v25 = vmax.f32 %v2063_v24, 0.0 }
 0x1c7   :  { %v1182_v15 = vadd.f32 %v1181_v13, %v1155_v29  ;;  %v1094_v10 = vmax.f32 %v1024_v6, 0.0  ;;  %v846_v48 = vadd.f32 %v845_v43, %v757_v33  ;;  %v1026_v51 = vpop.f32.mrf.mxu1  ;;  %v1065_v6 = vmax.f32 %v2066_v44, 0.0 }
 0x1c9   :  { %v1126_v31 = vsub.f32 %v1062_v12, %v1094_v10  ;;  %v1093_v19 = vmax.f32 %v846_v48, 0.0 }
 0x1ca   :  { %v937_v17 = vpop.f32.mrf.mxu0 }
 0x1cb   :  { %v1158_v54 = vmul.f32 %v1126_v31, %v1126_v31  ;;  %v1125_v20 = vsub.f32 %v1061_v27, %v1093_v19  ;;  %v938_v22 = vadd.f32 %v937_v17, %v1992_v56 }
 0x1cc   :  { %v759_v23 = vpop.f32.mrf.mxu2 }
 0x1cd   :  { %v1204_v38 = vadd.f32 %v1203_v18, %v1158_v54  ;;  %v1157_v47 = vmul.f32 %v1125_v20, %v1125_v20  ;;  %v1027_v55 = vadd.f32 %v1026_v51, %v938_v22  ;;  %v760_v62 = vadd.f32 %v759_v23, %v1994_v41  ;;  %v848_v61 = vpop.f32.mrf.mxu3 }
 0x1ce   :  { %v1068_v54 = vmax.f32 %v2071_v40, 0.0 }
 0x1cf   :  { %v1183_v45 = vadd.f32 %v1182_v15, %v1157_v47  ;;  %v1096_v49 = vmax.f32 %v1027_v55, 0.0  ;;  %v849_v0 = vadd.f32 %v848_v61, %v760_v62  ;;  %v1028_v3 = vpop.f32.mrf.mxu1 }
 0x1d1   :  { %v1128_v50 = vsub.f32 %v1064_v37, %v1096_v49  ;;  %v1095_v13 = vmax.f32 %v849_v0, 0.0 }
 0x1d2   :  { %v939_v1 = vpop.f32.mrf.mxu0 }
 0x1d3   :  { %v1160_v42 = vmul.f32 %v1128_v50, %v1128_v50  ;;  %v1127_v35 = vsub.f32 %v1063_v26, %v1095_v13  ;;  %v940_v30 = vadd.f32 %v939_v1, %v1992_v56  ;;  %v1070_v13 = vmax.f32 %v2081_v63, 0.0 }
 0x1d4   :  { %v761_v28 = vpop.f32.mrf.mxu2 }
 0x1d5   :  { %v1205_v58 = vadd.f32 %v1204_v38, %v1160_v42  ;;  %v1159_v60 = vmul.f32 %v1127_v35, %v1127_v35  ;;  %v1029_v2 = vadd.f32 %v1028_v3, %v940_v30  ;;  %v762_v8 = vadd.f32 %v761_v28, %v1994_v41  ;;  %v850_v7 = vpop.f32.mrf.mxu3 }
 0x1d6   :  { %v1067_v38 = vmax.f32 %v2078_v52, 0.0  ;;  %v1069_v30 = vmax.f32 %v2084_v11, 0.0 }
 0x1d7   :  { %v1184_v21 = vadd.f32 %v1183_v45, %v1159_v60  ;;  %v1098_v18 = vmax.f32 %v1029_v2, 0.0  ;;  %v851_v29 = vadd.f32 %v850_v7, %v762_v8  ;;  %v1031_v16 = vpop.f32.mrf.mxu1 }
 0x1d9   :  { %v1130_v33 = vsub.f32 %v1066_v25, %v1098_v18  ;;  %v1097_v43 = vmax.f32 %v851_v29, 0.0 }
 0x1da   :  { %v942_v12 = vpop.f32.mrf.mxu0 }
 0x1db   :  { %v1162_v15 = vmul.f32 %v1130_v33, %v1130_v33  ;;  %v1129_v10 = vsub.f32 %v1065_v6, %v1097_v43  ;;  %v943_v48 = vadd.f32 %v942_v12, %v1992_v56  ;;  %v1072_v6 = vmax.f32 %v2089_v9, 0.0 }
 0x1dc   :  { %v764_v51 = vpop.f32.mrf.mxu2 }
 0x1dd   :  { %v1206_v27 = vadd.f32 %v1205_v58, %v1162_v15  ;;  %v1161_v31 = vmul.f32 %v1129_v10, %v1129_v10  ;;  %v1032_v19 = vadd.f32 %v1031_v16, %v943_v48  ;;  %v765_v17 = vadd.f32 %v764_v51, %v1994_v41  ;;  %v853_v24 = vpop.f32.mrf.mxu3 }
 0x1de   :  { %v1071_v15 = vmax.f32 %v2096_v39, 0.0  ;;  %v1073_v39 = vmax.f32 %v2102_v59, 0.0 }
 0x1df   :  { %v1185_v20 = vadd.f32 %v1184_v21, %v1161_v31  ;;  %v1100_v22 = vmax.f32 %v1032_v19, 0.0  ;;  %v854_v23 = vadd.f32 %v853_v24, %v765_v17  ;;  %v1033_v44 = vpop.f32.mrf.mxu1 }
 0x1e1   :  { %v1132_v47 = vsub.f32 %v1068_v54, %v1100_v22  ;;  %v1099_v55 = vmax.f32 %v854_v23, 0.0  ;;  %v1074_v23 = vmax.f32 %v2099_v34, 0.0 }
 0x1e2   :  { %v944_v62 = vpop.f32.mrf.mxu0 }
 0x1e3   :  { %v1164_v61 = vmul.f32 %v1132_v47, %v1132_v47  ;;  %v1131_v37 = vsub.f32 %v1067_v38, %v1099_v55  ;;  %v945_v45 = vadd.f32 %v944_v62, %v1992_v56 }
 0x1e4   :  { %v766_v49 = vpop.f32.mrf.mxu2 }
 0x1e5   :  { %v1207_v0 = vadd.f32 %v1206_v27, %v1164_v61  ;;  %v1163_v3 = vmul.f32 %v1131_v37, %v1131_v37  ;;  %v1034_v26 = vadd.f32 %v1033_v44, %v945_v45  ;;  %v767_v50 = vadd.f32 %v766_v49, %v1994_v41  ;;  %v855_v40 = vpop.f32.mrf.mxu3 }
 0x1e7   :  { %v1186_v1 = vadd.f32 %v1185_v20, %v1163_v3  ;;  %v1102_v42 = vmax.f32 %v1034_v26, 0.0  ;;  %v856_v35 = vadd.f32 %v855_v40, %v767_v50  ;;  %v1036_v52 = vpop.f32.mrf.mxu1 }
 0x1e9   :  { %v1134_v28 = vsub.f32 %v1070_v13, %v1102_v42  ;;  %v1101_v58 = vmax.f32 %v856_v35, 0.0 }
 0x1ea   :  { %v947_v60 = vpop.f32.mrf.mxu0 }
 0x1eb   :  { %v1166_v2 = vmul.f32 %v1134_v28, %v1134_v28  ;;  %v1133_v8 = vsub.f32 %v1069_v30, %v1101_v58  ;;  %v948_v7 = vadd.f32 %v947_v60, %v1992_v56 }
 0x1ec   :  { %v769_v25 = vpop.f32.mrf.mxu2 }
 0x1ed   :  { %v1208_v21 = vadd.f32 %v1207_v0, %v1166_v2  ;;  %v1165_v18 = vmul.f32 %v1133_v8, %v1133_v8  ;;  %v1037_v29 = vadd.f32 %v1036_v52, %v948_v7  ;;  %v770_v16 = vadd.f32 %v769_v25, %v1994_v41  ;;  %v858_v63 = vpop.f32.mrf.mxu3 }
 0x1ee   :  { %v1075_v52 = vmax.f32 %v2114_v57, 0.0 }
 0x1ef   :  { %v1187_v33 = vadd.f32 %v1186_v1, %v1165_v18  ;;  %v1104_v43 = vmax.f32 %v1037_v29, 0.0  ;;  %v859_v12 = vadd.f32 %v858_v63, %v770_v16  ;;  %v1038_v11 = vpop.f32.mrf.mxu1  ;;  %v1076_v1 = vmax.f32 %v2107_v46, 0.0 }
 0x1f0   :  { %v1078_v63 = vmax.f32 %v2117_v5, 0.0 }
 0x1f1   :  { %v1136_v10 = vsub.f32 %v1072_v6, %v1104_v43  ;;  %v1103_v48 = vmax.f32 %v859_v12, 0.0  ;;  %v1077_v43 = vmax.f32 %v2120_v4, 0.0 }
 0x1f2   :  { %v949_v51 = vpop.f32.mrf.mxu0 }
 0x1f3   :  { %v1168_v27 = vmul.f32 %v1136_v10, %v1136_v10  ;;  %v1135_v31 = vsub.f32 %v1071_v15, %v1103_v48  ;;  %v950_v19 = vadd.f32 %v949_v51, %v1992_v56 }
 0x1f4   :  { %v771_v17 = vpop.f32.mrf.mxu2 }
 0x1f5   :  { %v1209_v24 = vadd.f32 %v1208_v21, %v1168_v27  ;;  %v1167_v54 = vmul.f32 %v1135_v31, %v1135_v31  ;;  %v1039_v20 = vadd.f32 %v1038_v11, %v950_v19  ;;  %v772_v22 = vadd.f32 %v771_v17, %v1994_v41  ;;  %v860_v9 = vpop.f32.mrf.mxu3 }
 0x1f7   :  { %v1188_v44 = vadd.f32 %v1187_v33, %v1167_v54  ;;  %v1106_v38 = vmax.f32 %v1039_v20, 0.0  ;;  %v861_v47 = vadd.f32 %v860_v9, %v772_v22  ;;  %v1041_v61 = vpop.f32.mrf.mxu1  ;;  %v1079_v54 = vmax.f32 %v2128_v53, 0.0 }
 0x1f9   :  { %v1138_v55 = vsub.f32 %v1074_v23, %v1106_v38  ;;  %v1105_v62 = vmax.f32 %v861_v47, 0.0  ;;  %v1081_v47 = vmax.f32 %v2134_v36, 0.0 }
 0x1fa   :  { %v952_v37 = vpop.f32.mrf.mxu0 }
 0x1fb   :  { %v1170_v45 = vmul.f32 %v1138_v55, %v1138_v55  ;;  %v1137_v49 = vsub.f32 %v1073_v39, %v1105_v62  ;;  %v953_v0 = vadd.f32 %v952_v37, %v1992_v56 }
 0x1fc   :  { %v774_v3 = vpop.f32.mrf.mxu2 }
 0x1fd   :  { %v1210_v26 = vadd.f32 %v1209_v24, %v1170_v45  ;;  %v1169_v50 = vmul.f32 %v1137_v49, %v1137_v49  ;;  %v1042_v40 = vadd.f32 %v1041_v61, %v953_v0  ;;  %v775_v13 = vadd.f32 %v774_v3, %v1994_v41  ;;  %v863_v34 = vpop.f32.mrf.mxu3 }
 0x1fe   :  { %v1080_v0 = vmax.f32 %v2125_v14, 0.0 }
 0x1ff   :  { %v1189_v42 = vadd.f32 %v1188_v44, %v1169_v50  ;;  %v1108_v35 = vmax.f32 %v1042_v40, 0.0  ;;  %v864_v59 = vadd.f32 %v863_v34, %v775_v13  ;;  %v1043_v7 = vpop.f32.mrf.mxu1 }
 0x201   :  { %v1140_v30 = vsub.f32 %v1076_v1, %v1108_v35  ;;  %v1107_v28 = vmax.f32 %v864_v59, 0.0 }
 0x202   :  { %v954_v58 = vpop.f32.mrf.mxu0 }
 0x203   :  { %v1172_v60 = vmul.f32 %v1140_v30, %v1140_v30  ;;  %v1139_v2 = vsub.f32 %v1075_v52, %v1107_v28  ;;  %v955_v8 = vadd.f32 %v954_v58, %v1992_v56  ;;  %v1082_v52 = vmax.f32 %v2131_v32, 0.0 }
 0x204   :  { %v776_v25 = vpop.f32.mrf.mxu2 }
 0x205   :  { %v1211_v21 = vadd.f32 %v1210_v26, %v1172_v60  ;;  %v1171_v18 = vmul.f32 %v1139_v2, %v1139_v2  ;;  %v1044_v29 = vadd.f32 %v1043_v7, %v955_v8  ;;  %v777_v16 = vadd.f32 %v776_v25, %v1994_v41  ;;  %v865_v46 = vpop.f32.mrf.mxu3 }
 0x207   :  { %v1190_v6 = vadd.f32 %v1189_v42, %v1171_v18  ;;  %v1110_v33 = vmax.f32 %v1044_v29, 0.0  ;;  %v866_v57 = vadd.f32 %v865_v46, %v777_v16  ;;  %v1046_v62 = vpop.f32.mrf.mxu1 }
 0x209   :  { %v1142_v12 = vsub.f32 %v1078_v63, %v1110_v33  ;;  %v1109_v11 = vmax.f32 %v866_v57, 0.0 }
 0x20b   :  { %v1174_v15 = vmul.f32 %v1142_v12, %v1142_v12  ;;  %v1141_v10 = vsub.f32 %v1077_v43, %v1109_v11 }
 0x20c   :  { %v779_v48 = vpop.f32.mrf.mxu2 }
 0x20d   :  { %v1212_v51 = vadd.f32 %v1211_v21, %v1174_v15  ;;  %v1173_v27 = vmul.f32 %v1141_v10, %v1141_v10  ;;  %v780_v31 = vadd.f32 %v779_v48, %v1994_v41  ;;  %v868_v19 = vpop.f32.mrf.mxu3 }
 0x20f   :  { %v1191_v17 = vadd.f32 %v1190_v6, %v1173_v27  ;;  %v869_v24 = vadd.f32 %v868_v19, %v780_v31  ;;  %v1048_v1 = vpop.f32.mrf.mxu1 }
 0x211   :  { %v1111_v5 = vmax.f32 %v869_v24, 0.0 }
 0x213   :  { %v1143_v20 = vsub.f32 %v1079_v54, %v1111_v5 }
 0x214   :  { %v781_v22 = vpop.f32.mrf.mxu2 }
 0x215   :  { %v1175_v9 = vmul.f32 %v1143_v20, %v1143_v20  ;;  %v782_v4 = vadd.f32 %v781_v22, %v1994_v41  ;;  %v870_v23 = vpop.f32.mrf.mxu3 }
 0x217   :  { %v1192_v44 = vadd.f32 %v1191_v17, %v1175_v9  ;;  %v871_v38 = vadd.f32 %v870_v23, %v782_v4 }
 0x219   :  { %v1113_v39 = vmax.f32 %v871_v38, 0.0 }
 0x21b   :  { %v1145_v55 = vsub.f32 %v1081_v47, %v1113_v39 }
 0x21c   :  { %v957_v61 = vpop.f32.mrf.mxu2 }
 0x21d   :  { %v1177_v37 = vmul.f32 %v1145_v55, %v1145_v55  ;;  %v958_v45 = vadd.f32 %v957_v61, %v1992_v56 }
 0x21f   :  { %v1193_v49 = vadd.f32 %v1192_v44, %v1177_v37  ;;  %v1047_v53 = vadd.f32 %v1046_v62, %v958_v45 }
 0x221   :  { %v1194_v3 = vrot.slane %v1193_v49, 4  ;;  %v1112_v26 = vmax.f32 %v1047_v53, 0.0 }
 0x223   :  { %v1195_v50 = vadd.f32 %v1194_v3, %v1193_v49  ;;  %v1144_v41 = vsub.f32 %v1080_v0, %v1112_v26 }
 0x224   :  { %v959_v40 = vpop.f32.mrf.mxu2 }
 0x225   :  { %v1196_v13 = vrot.slane %v1195_v50, 2  ;;  %v1176_v34 = vmul.f32 %v1144_v41, %v1144_v41  ;;  %v960_v36 = vadd.f32 %v959_v40, %v1992_v56 }
 0x227   :  { %v1197_v42 = vadd.f32 %v1196_v13, %v1195_v50  ;;  %v1213_v35 = vadd.f32 %v1212_v51, %v1176_v34  ;;  %v1049_v59 = vadd.f32 %v1048_v1, %v960_v36 }
 0x229   :  { %v1198_v30 = vrot.slane %v1197_v42, 1  ;;  %v1114_v28 = vmax.f32 %v1049_v59, 0.0 }
 0x22b   :  { %v1199_v58 = vadd.f32 %v1198_v30, %v1197_v42  ;;  %v1146_v60 = vsub.f32 %v1082_v52, %v1114_v28 }
 0x22d   :  { %1221 = vst [vmem:[%s2212_s6] sm:$0xff] %v1199_v58  ;;  %v1178_v14 = vmul.f32 %v1146_v60, %v1146_v60 }
 0x22f   :  { %v1214_v2 = vadd.f32 %v1213_v35, %v1178_v14 }
 0x231   :  { %v1215_v8 = vrot.slane %v1214_v2, 4 }
 0x233   :  { %v1216_v7 = vadd.f32 %v1215_v8, %v1214_v2 }
 0x235   :  { %v1217_v25 = vrot.slane %v1216_v7, 2 }
 0x237   :  { %v1218_v56 = vadd.f32 %v1217_v25, %v1216_v7 }
 0x239   :  { %v1219_v21 = vrot.slane %v1218_v56, 1 }
 0x23b   :  { %v1220_v18 = vadd.f32 %v1219_v21, %v1218_v56 }
 0x23d   :  { %1222 = vst [vmem:[%s2212_s6 + $0x8] sm:$0xff] %v1220_v18 }

</bundles_post_ra>
